<compile_context>
chip_gen: v5e
topology: v5e:2x2
jax: 0.10.0
libtpu: 0.0.40
codegen_flags: <defaults>
</compile_context>

<pallas_src>
import jax
import jax.numpy as jnp
from jax import lax
from jax.experimental import pallas as pl
from jax.experimental.pallas import tpu as pltpu


def fold_bn(gamma, beta, mean, var, eps=1e-5):
    scale = gamma / jnp.sqrt(var + eps)
    bias = beta - mean * scale
    return scale, bias


def _make_bottleneck_kernel(H, W, Cm, C2):
    HW = H * W
    PAD = W + 1  # covers the largest row/col tap offset (+/-(W+1))
    TAPS = tuple((dy, dx) for dy in range(3) for dx in range(3))

    def conv3x3_bias_relu(x_bf16, w_ref, b_ref, keep_col0, keep_colW, cout):
        """3x3 'same' conv + bias + ReLU.

        x_bf16: (Cin, HW) bf16, spatial flattened onto the lane axis.
        w_ref : (9, cout, Cin) bf16 ref, BN scale already folded in.
        b_ref : (cout, 1) f32 ref (folded BN bias).
        Returns (cout, HW) f32.
        """
        cin = x_bf16.shape[0]
        # Single zero-padded copy on the lane axis: row-overflow taps (dy) read
        # from the padding region and contribute exactly 0.
        zpad = jnp.zeros((cin, PAD), jnp.bfloat16)
        padded = jnp.concatenate([zpad, x_bf16, zpad], axis=1)  # (Cin, HW+2W+2)

        acc = jnp.zeros((cout, HW), jnp.float32)
        for t, (dy, dx) in enumerate(TAPS):
            # out[p] = x[p + (dy-1)*W + (dx-1)]  (zero where the source row is
            # out of range, handled by the zero padding above).
            start = dy * W + dx
            tap = padded[:, start:start + HW]                    # (Cin, HW)
            # Column wrap through the flattened lane axis:
            #   dx-1 == -1 reads the previous row's col W-1 at output col 0,
            #   dx-1 == +1 reads the next row's col 0 at output col W-1.
            # Zero those output columns (same effect as conv zero padding).
            if dx == 0:
                tap = jnp.where(keep_col0, tap, 0)
            elif dx == 2:
                tap = jnp.where(keep_colW, tap, 0)
            # Per-tap matmul accumulation (no big im2col temporary).
            acc = acc + jnp.dot(w_ref[t], tap,
                                preferred_element_type=jnp.float32)
        # Folded-BN bias + ReLU in f32.
        return jnp.maximum(acc + b_ref[...], 0.0)

    def kernel(x_ref, w1_ref, b1_ref, w2_ref, b2_ref, out_ref):
        # x_ref: (1, C1, HW) f32    out_ref: (1, C2, HW) f32 (lane-dense)
        col = lax.broadcasted_iota(jnp.int32, (1, HW), 1) % W
        keep_col0 = col != 0          # zero output col 0   for dx-1 == -1 taps
        keep_colW = col != (W - 1)    # zero output col W-1 for dx-1 == +1 taps

        x = x_ref[0]                                                # (C1, HW) f32
        y1 = conv3x3_bias_relu(x.astype(jnp.bfloat16), w1_ref, b1_ref,
                               keep_col0, keep_colW, Cm)            # (Cm, HW) f32
        y2 = conv3x3_bias_relu(y1.astype(jnp.bfloat16), w2_ref, b2_ref,
                               keep_col0, keep_colW, C2)            # (C2, HW) f32
        out_ref[...] = (x + y2)[None]                               # residual add

    return kernel


def bottleneck_pallas(x_nchw, w1_oihw, bn1, w2_oihw, bn2):
    """x_nchw: (N, C1, H, W) float32. Returns (N, C2, H, W) float32."""
    N, C1, H, W = x_nchw.shape
    Cm = w1_oihw.shape[0]
    C2 = w2_oihw.shape[0]
    assert C1 == C2, "shortcut add requires c1 == c2"
    HW = H * W

    # Free reshape (no HBM transpose / pad): spatial flattened onto lanes.
    x2d = x_nchw.reshape(N, C1, HW)

    # Fold eval-mode BatchNorm: scale goes into the conv weights (f32 fold,
    # THEN bf16 cast), bias stays a per-channel f32 add inside the kernel.
    s1, b1 = fold_bn(*bn1)
    s2, b2 = fold_bn(*bn2)
    # OIHW * scale[o] -> (ky, kx, O, I) -> (9, O, I), bf16 for the MXU.
    w1_t = (jnp.transpose(w1_oihw * s1[:, None, None, None], (2, 3, 0, 1))
            .reshape(9, Cm, C1).astype(jnp.bfloat16))
    w2_t = (jnp.transpose(w2_oihw * s2[:, None, None, None], (2, 3, 0, 1))
            .reshape(9, C2, Cm).astype(jnp.bfloat16))
    b1 = b1.reshape(Cm, 1).astype(jnp.float32)
    b2 = b2.reshape(C2, 1).astype(jnp.float32)

    kernel = _make_bottleneck_kernel(H, W, Cm, C2)

    out2d = pl.pallas_call(
        kernel,
        out_shape=jax.ShapeDtypeStruct((N, C2, HW), jnp.float32),
        grid_spec=pltpu.PrefetchScalarGridSpec(
            num_scalar_prefetch=0,
            grid=(N,),  # N >= 2 grid steps on a "parallel" axis -> both v7x TCs
            in_specs=[
                pl.BlockSpec((1, C1, HW), lambda n: (n, 0, 0)),
                pl.BlockSpec((9, Cm, C1), lambda n: (0, 0, 0)),
                pl.BlockSpec((Cm, 1), lambda n: (0, 0)),
                pl.BlockSpec((9, C2, Cm), lambda n: (0, 0, 0)),
                pl.BlockSpec((C2, 1), lambda n: (0, 0)),
            ],
            out_specs=pl.BlockSpec((1, C2, HW), lambda n: (n, 0, 0)),
        ),
        compiler_params=pltpu.CompilerParams(
            dimension_semantics=("parallel",)),
    )(x2d, w1_t, b1, w2_t, b2)

    return out2d.reshape(N, C2, H, W)


# ---------------- pure-JAX reference (f32, for correctness check) ------------
def conv_bn_relu_ref(x_nchw, w_oihw, bn, eps=1e-5):
    y = lax.conv_general_dilated(
        x_nchw, w_oihw, window_strides=(1, 1), padding=((1, 1), (1, 1)),
        dimension_numbers=("NCHW", "OIHW", "NCHW"))
    gamma, beta, mean, var = bn
    y = (y - mean[None, :, None, None]) / jnp.sqrt(var[None, :, None, None] + eps)
    y = y * gamma[None, :, None, None] + beta[None, :, None, None]
    return jnp.maximum(y, 0.0)


def bottleneck_ref(x, w1, bn1, w2, bn2):
    return x + conv_bn_relu_ref(conv_bn_relu_ref(x, w1, bn1), w2, bn2)


if __name__ == "__main__":
    # Bottleneck(c1=4, c2=4, shortcut=True, g=1, k=(3,3), e=0.5) -> c_ = 2
    N, C1, H, W = 2, 4, 16, 16
    C2 = 4
    Cm = int(C2 * 0.5)

    key = jax.random.PRNGKey(0)
    k = jax.random.split(key, 11)
    w1 = jax.random.normal(k[0], (Cm, C1, 3, 3), jnp.float32) * 0.2
    w2 = jax.random.normal(k[1], (C2, Cm, 3, 3), jnp.float32) * 0.2
    # BatchNorm params (eval-mode running stats), deterministic & non-trivial
    bn1 = (1.0 + 0.1 * jax.random.normal(k[2], (Cm,), jnp.float32),      # gamma
           0.1 * jax.random.normal(k[3], (Cm,), jnp.float32),            # beta
           0.05 * jax.random.normal(k[4], (Cm,), jnp.float32),           # running_mean
           0.5 + jnp.abs(jax.random.normal(k[5], (Cm,), jnp.float32)))   # running_var
    bn2 = (1.0 + 0.1 * jax.random.normal(k[6], (C2,), jnp.float32),
           0.1 * jax.random.normal(k[7], (C2,), jnp.float32),
           0.05 * jax.random.normal(k[8], (C2,), jnp.float32),
           0.5 + jnp.abs(jax.random.normal(k[9], (C2,), jnp.float32)))

    x = jax.random.normal(k[10], (N, C1, H, W), jnp.float32)

    out = jax.block_until_ready(bottleneck_pallas(x, w1, bn1, w2, bn2))
    ref = jax.block_until_ready(bottleneck_ref(x, w1, bn1, w2, bn2))

    assert out.shape == (N, C2, H, W), out.shape
    # bf16 MXU inputs (f32 accumulation) across two stacked convs -> looser
    # tolerance than a pure-f32 implementation.
    max_err = float(jnp.max(jnp.abs(out - ref)))
    assert jnp.allclose(out, ref, atol=5e-2, rtol=5e-2), max_err
    print("KERNEL_OK")
</pallas_src>

<mosaic_0001>
module attributes {stable_mosaic.version = 11 : i64} {
  func.func @kernel(%arg0: i32, %arg1: memref<1x4x256xf32, #tpu.memory_space<vmem>>, %arg2: memref<9x2x4xbf16, #tpu.memory_space<vmem>>, %arg3: memref<2x1xf32, #tpu.memory_space<vmem>>, %arg4: memref<9x4x2xbf16, #tpu.memory_space<vmem>>, %arg5: memref<4x1xf32, #tpu.memory_space<vmem>>, %arg6: memref<1x4x256xf32, #tpu.memory_space<vmem>>) attributes {dimension_semantics = [#tpu.dimension_semantics<parallel>], iteration_bounds = array<i64: 2>, scalar_prefetch = 0 : i64, scratch_operands = 0 : i64, tpu.core_type = #tpu.core_type<tc>, window_params = [{transform_indices = @transform_0, window_bounds = array<i64: 1, 4, 256>}, {pipeline_mode = #tpu.pipeline_mode<synchronous>, transform_indices = @transform_1, window_bounds = array<i64: 9, 2, 4>}, {pipeline_mode = #tpu.pipeline_mode<synchronous>, transform_indices = @transform_2, window_bounds = array<i64: 2, 1>}, {pipeline_mode = #tpu.pipeline_mode<synchronous>, transform_indices = @transform_3, window_bounds = array<i64: 9, 4, 2>}, {pipeline_mode = #tpu.pipeline_mode<synchronous>, transform_indices = @transform_4, window_bounds = array<i64: 4, 1>}, {transform_indices = @transform_5, window_bounds = array<i64: 1, 4, 256>}]} {
    %0 = tpu.iota {dimensions = array<i32: 1>} : vector<1x256xi32>
    %c16_i32 = arith.constant 16 : i32
    %c0_i32 = arith.constant 0 : i32
    %1 = arith.cmpi eq, %c16_i32, %c0_i32 : i32
    %c1_i32 = arith.constant 1 : i32
    %2 = arith.select %1, %c1_i32, %c16_i32 : i32
    %3 = vector.broadcast %2 : i32 to vector<1x256xi32>
    %4 = arith.remsi %0, %3 : vector<1x256xi32>
    %c0_i32_0 = arith.constant 0 : i32
    %5 = vector.broadcast %c0_i32_0 : i32 to vector<1x256xi32>
    %6 = arith.cmpi ne, %4, %5 : vector<1x256xi32>
    %c0_i32_1 = arith.constant 0 : i32
    %7 = vector.broadcast %c0_i32_1 : i32 to vector<1x256xi32>
    %8 = arith.cmpi slt, %4, %7 : vector<1x256xi32>
    %c0_i32_2 = arith.constant 0 : i32
    %9 = arith.cmpi slt, %2, %c0_i32_2 : i32
    %10 = vector.broadcast %9 : i1 to vector<1x256xi1>
    %11 = vector.broadcast %10 : vector<1x256xi1> to vector<1x256xi1>
    %12 = arith.xori %8, %11 : vector<1x256xi1>
    %13 = arith.andi %12, %6 : vector<1x256xi1>
    %14 = vector.broadcast %2 : i32 to vector<1x256xi32>
    %15 = arith.addi %4, %14 : vector<1x256xi32>
    %16 = arith.select %13, %15, %4 : vector<1x256xi1>, vector<1x256xi32>
    %c0_i32_3 = arith.constant 0 : i32
    %17 = vector.broadcast %c0_i32_3 : i32 to vector<1x256xi32>
    %18 = arith.cmpi ne, %16, %17 : vector<1x256xi32>
    %c15_i32 = arith.constant 15 : i32
    %19 = vector.broadcast %c15_i32 : i32 to vector<1x256xi32>
    %20 = arith.cmpi ne, %16, %19 : vector<1x256xi32>
    %c0 = arith.constant 0 : index
    %c0_4 = arith.constant 0 : index
    %c0_5 = arith.constant 0 : index
    %21 = vector.load %arg1[%c0, %c0_4, %c0_5] : memref<1x4x256xf32, #tpu.memory_space<vmem>>, vector<1x4x256xf32>
    %22 = vector.shape_cast %21 : vector<1x4x256xf32> to vector<4x256xf32>
    %23 = arith.truncf %22 : vector<4x256xf32> to vector<4x256xbf16>
    %cst = arith.constant 0.000000e+00 : bf16
    %24 = vector.broadcast %cst : bf16 to vector<4x17xbf16>
    %25 = tpu.concatenate %24, %23, %24 in 1 : vector<4x17xbf16>, vector<4x256xbf16>, vector<4x17xbf16> -> vector<4x290xbf16>
    %cst_6 = arith.constant 0.000000e+00 : f32
    %26 = vector.broadcast %cst_6 : f32 to vector<2x256xf32>
    %27 = vector.extract_strided_slice %25 {offsets = [0, 0], sizes = [4, 256], strides = [1, 1]} : vector<4x290xbf16> to vector<4x256xbf16>
    %c0_i32_7 = arith.constant 0 : i32
    %28 = arith.sitofp %c0_i32_7 : i32 to bf16
    %29 = vector.shape_cast %18 : vector<1x256xi1> to vector<1x256xi1>
    %30 = vector.broadcast %29 : vector<1x256xi1> to vector<4x256xi1>
    %31 = vector.broadcast %28 : bf16 to vector<4x256xbf16>
    %32 = arith.select %30, %27, %31 : vector<4x256xi1>, vector<4x256xbf16>
    %c0_8 = arith.constant 0 : index
    %c0_9 = arith.constant 0 : index
    %c0_10 = arith.constant 0 : index
    %33 = vector.load %arg2[%c0_8, %c0_9, %c0_10] : memref<9x2x4xbf16, #tpu.memory_space<vmem>>, vector<1x2x4xbf16>
    %34 = vector.shape_cast %33 : vector<1x2x4xbf16> to vector<2x4xbf16>
    %cst_11 = arith.constant dense<0.000000e+00> : vector<2x256xf32>
    %35 = tpu.matmul %34, %32, %cst_11 {dimension_numbers = #tpu.dot_dimension_numbers<[1], [0], [0], [1], [0, 0, 1, 1], [], []>} : vector<2x4xbf16>, vector<4x256xbf16>, vector<2x256xf32> -> vector<2x256xf32>
    %36 = arith.addf %26, %35 : vector<2x256xf32>
    %37 = vector.extract_strided_slice %25 {offsets = [0, 1], sizes = [4, 256], strides = [1, 1]} : vector<4x290xbf16> to vector<4x256xbf16>
    %c1 = arith.constant 1 : index
    %c0_12 = arith.constant 0 : index
    %c0_13 = arith.constant 0 : index
    %38 = vector.load %arg2[%c1, %c0_12, %c0_13] : memref<9x2x4xbf16, #tpu.memory_space<vmem>>, vector<1x2x4xbf16>
    %39 = vector.shape_cast %38 : vector<1x2x4xbf16> to vector<2x4xbf16>
    %cst_14 = arith.constant dense<0.000000e+00> : vector<2x256xf32>
    %40 = tpu.matmul %39, %37, %cst_14 {dimension_numbers = #tpu.dot_dimension_numbers<[1], [0], [0], [1], [0, 0, 1, 1], [], []>} : vector<2x4xbf16>, vector<4x256xbf16>, vector<2x256xf32> -> vector<2x256xf32>
    %41 = arith.addf %36, %40 : vector<2x256xf32>
    %42 = vector.extract_strided_slice %25 {offsets = [0, 2], sizes = [4, 256], strides = [1, 1]} : vector<4x290xbf16> to vector<4x256xbf16>
    %c0_i32_15 = arith.constant 0 : i32
    %43 = arith.sitofp %c0_i32_15 : i32 to bf16
    %44 = vector.shape_cast %20 : vector<1x256xi1> to vector<1x256xi1>
    %45 = vector.broadcast %44 : vector<1x256xi1> to vector<4x256xi1>
    %46 = vector.broadcast %43 : bf16 to vector<4x256xbf16>
    %47 = arith.select %45, %42, %46 : vector<4x256xi1>, vector<4x256xbf16>
    %c2 = arith.constant 2 : index
    %c0_16 = arith.constant 0 : index
    %c0_17 = arith.constant 0 : index
    %48 = vector.load %arg2[%c2, %c0_16, %c0_17] : memref<9x2x4xbf16, #tpu.memory_space<vmem>>, vector<1x2x4xbf16>
    %49 = vector.shape_cast %48 : vector<1x2x4xbf16> to vector<2x4xbf16>
    %cst_18 = arith.constant dense<0.000000e+00> : vector<2x256xf32>
    %50 = tpu.matmul %49, %47, %cst_18 {dimension_numbers = #tpu.dot_dimension_numbers<[1], [0], [0], [1], [0, 0, 1, 1], [], []>} : vector<2x4xbf16>, vector<4x256xbf16>, vector<2x256xf32> -> vector<2x256xf32>
    %51 = arith.addf %41, %50 : vector<2x256xf32>
    %52 = vector.extract_strided_slice %25 {offsets = [0, 16], sizes = [4, 256], strides = [1, 1]} : vector<4x290xbf16> to vector<4x256xbf16>
    %c0_i32_19 = arith.constant 0 : i32
    %53 = arith.sitofp %c0_i32_19 : i32 to bf16
    %54 = vector.shape_cast %18 : vector<1x256xi1> to vector<1x256xi1>
    %55 = vector.broadcast %54 : vector<1x256xi1> to vector<4x256xi1>
    %56 = vector.broadcast %53 : bf16 to vector<4x256xbf16>
    %57 = arith.select %55, %52, %56 : vector<4x256xi1>, vector<4x256xbf16>
    %c3 = arith.constant 3 : index
    %c0_20 = arith.constant 0 : index
    %c0_21 = arith.constant 0 : index
    %58 = vector.load %arg2[%c3, %c0_20, %c0_21] : memref<9x2x4xbf16, #tpu.memory_space<vmem>>, vector<1x2x4xbf16>
    %59 = vector.shape_cast %58 : vector<1x2x4xbf16> to vector<2x4xbf16>
    %cst_22 = arith.constant dense<0.000000e+00> : vector<2x256xf32>
    %60 = tpu.matmul %59, %57, %cst_22 {dimension_numbers = #tpu.dot_dimension_numbers<[1], [0], [0], [1], [0, 0, 1, 1], [], []>} : vector<2x4xbf16>, vector<4x256xbf16>, vector<2x256xf32> -> vector<2x256xf32>
    %61 = arith.addf %51, %60 : vector<2x256xf32>
    %62 = vector.extract_strided_slice %25 {offsets = [0, 17], sizes = [4, 256], strides = [1, 1]} : vector<4x290xbf16> to vector<4x256xbf16>
    %c4 = arith.constant 4 : index
    %c0_23 = arith.constant 0 : index
    %c0_24 = arith.constant 0 : index
    %63 = vector.load %arg2[%c4, %c0_23, %c0_24] : memref<9x2x4xbf16, #tpu.memory_space<vmem>>, vector<1x2x4xbf16>
    %64 = vector.shape_cast %63 : vector<1x2x4xbf16> to vector<2x4xbf16>
    %cst_25 = arith.constant dense<0.000000e+00> : vector<2x256xf32>
    %65 = tpu.matmul %64, %62, %cst_25 {dimension_numbers = #tpu.dot_dimension_numbers<[1], [0], [0], [1], [0, 0, 1, 1], [], []>} : vector<2x4xbf16>, vector<4x256xbf16>, vector<2x256xf32> -> vector<2x256xf32>
    %66 = arith.addf %61, %65 : vector<2x256xf32>
    %67 = vector.extract_strided_slice %25 {offsets = [0, 18], sizes = [4, 256], strides = [1, 1]} : vector<4x290xbf16> to vector<4x256xbf16>
    %c0_i32_26 = arith.constant 0 : i32
    %68 = arith.sitofp %c0_i32_26 : i32 to bf16
    %69 = vector.shape_cast %20 : vector<1x256xi1> to vector<1x256xi1>
    %70 = vector.broadcast %69 : vector<1x256xi1> to vector<4x256xi1>
    %71 = vector.broadcast %68 : bf16 to vector<4x256xbf16>
    %72 = arith.select %70, %67, %71 : vector<4x256xi1>, vector<4x256xbf16>
    %c5 = arith.constant 5 : index
    %c0_27 = arith.constant 0 : index
    %c0_28 = arith.constant 0 : index
    %73 = vector.load %arg2[%c5, %c0_27, %c0_28] : memref<9x2x4xbf16, #tpu.memory_space<vmem>>, vector<1x2x4xbf16>
    %74 = vector.shape_cast %73 : vector<1x2x4xbf16> to vector<2x4xbf16>
    %cst_29 = arith.constant dense<0.000000e+00> : vector<2x256xf32>
    %75 = tpu.matmul %74, %72, %cst_29 {dimension_numbers = #tpu.dot_dimension_numbers<[1], [0], [0], [1], [0, 0, 1, 1], [], []>} : vector<2x4xbf16>, vector<4x256xbf16>, vector<2x256xf32> -> vector<2x256xf32>
    %76 = arith.addf %66, %75 : vector<2x256xf32>
    %77 = vector.extract_strided_slice %25 {offsets = [0, 32], sizes = [4, 256], strides = [1, 1]} : vector<4x290xbf16> to vector<4x256xbf16>
    %c0_i32_30 = arith.constant 0 : i32
    %78 = arith.sitofp %c0_i32_30 : i32 to bf16
    %79 = vector.shape_cast %18 : vector<1x256xi1> to vector<1x256xi1>
    %80 = vector.broadcast %79 : vector<1x256xi1> to vector<4x256xi1>
    %81 = vector.broadcast %78 : bf16 to vector<4x256xbf16>
    %82 = arith.select %80, %77, %81 : vector<4x256xi1>, vector<4x256xbf16>
    %c6 = arith.constant 6 : index
    %c0_31 = arith.constant 0 : index
    %c0_32 = arith.constant 0 : index
    %83 = vector.load %arg2[%c6, %c0_31, %c0_32] : memref<9x2x4xbf16, #tpu.memory_space<vmem>>, vector<1x2x4xbf16>
    %84 = vector.shape_cast %83 : vector<1x2x4xbf16> to vector<2x4xbf16>
    %cst_33 = arith.constant dense<0.000000e+00> : vector<2x256xf32>
    %85 = tpu.matmul %84, %82, %cst_33 {dimension_numbers = #tpu.dot_dimension_numbers<[1], [0], [0], [1], [0, 0, 1, 1], [], []>} : vector<2x4xbf16>, vector<4x256xbf16>, vector<2x256xf32> -> vector<2x256xf32>
    %86 = arith.addf %76, %85 : vector<2x256xf32>
    %87 = vector.extract_strided_slice %25 {offsets = [0, 33], sizes = [4, 256], strides = [1, 1]} : vector<4x290xbf16> to vector<4x256xbf16>
    %c7 = arith.constant 7 : index
    %c0_34 = arith.constant 0 : index
    %c0_35 = arith.constant 0 : index
    %88 = vector.load %arg2[%c7, %c0_34, %c0_35] : memref<9x2x4xbf16, #tpu.memory_space<vmem>>, vector<1x2x4xbf16>
    %89 = vector.shape_cast %88 : vector<1x2x4xbf16> to vector<2x4xbf16>
    %cst_36 = arith.constant dense<0.000000e+00> : vector<2x256xf32>
    %90 = tpu.matmul %89, %87, %cst_36 {dimension_numbers = #tpu.dot_dimension_numbers<[1], [0], [0], [1], [0, 0, 1, 1], [], []>} : vector<2x4xbf16>, vector<4x256xbf16>, vector<2x256xf32> -> vector<2x256xf32>
    %91 = arith.addf %86, %90 : vector<2x256xf32>
    %92 = vector.extract_strided_slice %25 {offsets = [0, 34], sizes = [4, 256], strides = [1, 1]} : vector<4x290xbf16> to vector<4x256xbf16>
    %c0_i32_37 = arith.constant 0 : i32
    %93 = arith.sitofp %c0_i32_37 : i32 to bf16
    %94 = vector.shape_cast %20 : vector<1x256xi1> to vector<1x256xi1>
    %95 = vector.broadcast %94 : vector<1x256xi1> to vector<4x256xi1>
    %96 = vector.broadcast %93 : bf16 to vector<4x256xbf16>
    %97 = arith.select %95, %92, %96 : vector<4x256xi1>, vector<4x256xbf16>
    %c8 = arith.constant 8 : index
    %c0_38 = arith.constant 0 : index
    %c0_39 = arith.constant 0 : index
    %98 = vector.load %arg2[%c8, %c0_38, %c0_39] : memref<9x2x4xbf16, #tpu.memory_space<vmem>>, vector<1x2x4xbf16>
    %99 = vector.shape_cast %98 : vector<1x2x4xbf16> to vector<2x4xbf16>
    %cst_40 = arith.constant dense<0.000000e+00> : vector<2x256xf32>
    %100 = tpu.matmul %99, %97, %cst_40 {dimension_numbers = #tpu.dot_dimension_numbers<[1], [0], [0], [1], [0, 0, 1, 1], [], []>} : vector<2x4xbf16>, vector<4x256xbf16>, vector<2x256xf32> -> vector<2x256xf32>
    %101 = arith.addf %91, %100 : vector<2x256xf32>
    %c0_41 = arith.constant 0 : index
    %c0_42 = arith.constant 0 : index
    %102 = vector.load %arg3[%c0_41, %c0_42] : memref<2x1xf32, #tpu.memory_space<vmem>>, vector<2x1xf32>
    %103 = vector.broadcast %102 : vector<2x1xf32> to vector<2x256xf32>
    %104 = arith.addf %101, %103 : vector<2x256xf32>
    %cst_43 = arith.constant 0.000000e+00 : f32
    %105 = vector.broadcast %cst_43 : f32 to vector<2x256xf32>
    %106 = arith.maximumf %104, %105 : vector<2x256xf32>
    %107 = arith.truncf %106 : vector<2x256xf32> to vector<2x256xbf16>
    %cst_44 = arith.constant 0.000000e+00 : bf16
    %108 = vector.broadcast %cst_44 : bf16 to vector<2x17xbf16>
    %109 = tpu.concatenate %108, %107, %108 in 1 : vector<2x17xbf16>, vector<2x256xbf16>, vector<2x17xbf16> -> vector<2x290xbf16>
    %cst_45 = arith.constant 0.000000e+00 : f32
    %110 = vector.broadcast %cst_45 : f32 to vector<4x256xf32>
    %111 = vector.extract_strided_slice %109 {offsets = [0, 0], sizes = [2, 256], strides = [1, 1]} : vector<2x290xbf16> to vector<2x256xbf16>
    %c0_i32_46 = arith.constant 0 : i32
    %112 = arith.sitofp %c0_i32_46 : i32 to bf16
    %113 = vector.shape_cast %18 : vector<1x256xi1> to vector<1x256xi1>
    %114 = vector.broadcast %113 : vector<1x256xi1> to vector<2x256xi1>
    %115 = vector.broadcast %112 : bf16 to vector<2x256xbf16>
    %116 = arith.select %114, %111, %115 : vector<2x256xi1>, vector<2x256xbf16>
    %c0_47 = arith.constant 0 : index
    %c0_48 = arith.constant 0 : index
    %c0_49 = arith.constant 0 : index
    %117 = vector.load %arg4[%c0_47, %c0_48, %c0_49] : memref<9x4x2xbf16, #tpu.memory_space<vmem>>, vector<1x4x2xbf16>
    %118 = vector.shape_cast %117 : vector<1x4x2xbf16> to vector<4x2xbf16>
    %cst_50 = arith.constant dense<0.000000e+00> : vector<4x256xf32>
    %119 = tpu.matmul %118, %116, %cst_50 {dimension_numbers = #tpu.dot_dimension_numbers<[1], [0], [0], [1], [0, 0, 1, 1], [], []>} : vector<4x2xbf16>, vector<2x256xbf16>, vector<4x256xf32> -> vector<4x256xf32>
    %120 = arith.addf %110, %119 : vector<4x256xf32>
    %121 = vector.extract_strided_slice %109 {offsets = [0, 1], sizes = [2, 256], strides = [1, 1]} : vector<2x290xbf16> to vector<2x256xbf16>
    %c1_51 = arith.constant 1 : index
    %c0_52 = arith.constant 0 : index
    %c0_53 = arith.constant 0 : index
    %122 = vector.load %arg4[%c1_51, %c0_52, %c0_53] : memref<9x4x2xbf16, #tpu.memory_space<vmem>>, vector<1x4x2xbf16>
    %123 = vector.shape_cast %122 : vector<1x4x2xbf16> to vector<4x2xbf16>
    %cst_54 = arith.constant dense<0.000000e+00> : vector<4x256xf32>
    %124 = tpu.matmul %123, %121, %cst_54 {dimension_numbers = #tpu.dot_dimension_numbers<[1], [0], [0], [1], [0, 0, 1, 1], [], []>} : vector<4x2xbf16>, vector<2x256xbf16>, vector<4x256xf32> -> vector<4x256xf32>
    %125 = arith.addf %120, %124 : vector<4x256xf32>
    %126 = vector.extract_strided_slice %109 {offsets = [0, 2], sizes = [2, 256], strides = [1, 1]} : vector<2x290xbf16> to vector<2x256xbf16>
    %c0_i32_55 = arith.constant 0 : i32
    %127 = arith.sitofp %c0_i32_55 : i32 to bf16
    %128 = vector.shape_cast %20 : vector<1x256xi1> to vector<1x256xi1>
    %129 = vector.broadcast %128 : vector<1x256xi1> to vector<2x256xi1>
    %130 = vector.broadcast %127 : bf16 to vector<2x256xbf16>
    %131 = arith.select %129, %126, %130 : vector<2x256xi1>, vector<2x256xbf16>
    %c2_56 = arith.constant 2 : index
    %c0_57 = arith.constant 0 : index
    %c0_58 = arith.constant 0 : index
    %132 = vector.load %arg4[%c2_56, %c0_57, %c0_58] : memref<9x4x2xbf16, #tpu.memory_space<vmem>>, vector<1x4x2xbf16>
    %133 = vector.shape_cast %132 : vector<1x4x2xbf16> to vector<4x2xbf16>
    %cst_59 = arith.constant dense<0.000000e+00> : vector<4x256xf32>
    %134 = tpu.matmul %133, %131, %cst_59 {dimension_numbers = #tpu.dot_dimension_numbers<[1], [0], [0], [1], [0, 0, 1, 1], [], []>} : vector<4x2xbf16>, vector<2x256xbf16>, vector<4x256xf32> -> vector<4x256xf32>
    %135 = arith.addf %125, %134 : vector<4x256xf32>
    %136 = vector.extract_strided_slice %109 {offsets = [0, 16], sizes = [2, 256], strides = [1, 1]} : vector<2x290xbf16> to vector<2x256xbf16>
    %c0_i32_60 = arith.constant 0 : i32
    %137 = arith.sitofp %c0_i32_60 : i32 to bf16
    %138 = vector.shape_cast %18 : vector<1x256xi1> to vector<1x256xi1>
    %139 = vector.broadcast %138 : vector<1x256xi1> to vector<2x256xi1>
    %140 = vector.broadcast %137 : bf16 to vector<2x256xbf16>
    %141 = arith.select %139, %136, %140 : vector<2x256xi1>, vector<2x256xbf16>
    %c3_61 = arith.constant 3 : index
    %c0_62 = arith.constant 0 : index
    %c0_63 = arith.constant 0 : index
    %142 = vector.load %arg4[%c3_61, %c0_62, %c0_63] : memref<9x4x2xbf16, #tpu.memory_space<vmem>>, vector<1x4x2xbf16>
    %143 = vector.shape_cast %142 : vector<1x4x2xbf16> to vector<4x2xbf16>
    %cst_64 = arith.constant dense<0.000000e+00> : vector<4x256xf32>
    %144 = tpu.matmul %143, %141, %cst_64 {dimension_numbers = #tpu.dot_dimension_numbers<[1], [0], [0], [1], [0, 0, 1, 1], [], []>} : vector<4x2xbf16>, vector<2x256xbf16>, vector<4x256xf32> -> vector<4x256xf32>
    %145 = arith.addf %135, %144 : vector<4x256xf32>
    %146 = vector.extract_strided_slice %109 {offsets = [0, 17], sizes = [2, 256], strides = [1, 1]} : vector<2x290xbf16> to vector<2x256xbf16>
    %c4_65 = arith.constant 4 : index
    %c0_66 = arith.constant 0 : index
    %c0_67 = arith.constant 0 : index
    %147 = vector.load %arg4[%c4_65, %c0_66, %c0_67] : memref<9x4x2xbf16, #tpu.memory_space<vmem>>, vector<1x4x2xbf16>
    %148 = vector.shape_cast %147 : vector<1x4x2xbf16> to vector<4x2xbf16>
    %cst_68 = arith.constant dense<0.000000e+00> : vector<4x256xf32>
    %149 = tpu.matmul %148, %146, %cst_68 {dimension_numbers = #tpu.dot_dimension_numbers<[1], [0], [0], [1], [0, 0, 1, 1], [], []>} : vector<4x2xbf16>, vector<2x256xbf16>, vector<4x256xf32> -> vector<4x256xf32>
    %150 = arith.addf %145, %149 : vector<4x256xf32>
    %151 = vector.extract_strided_slice %109 {offsets = [0, 18], sizes = [2, 256], strides = [1, 1]} : vector<2x290xbf16> to vector<2x256xbf16>
    %c0_i32_69 = arith.constant 0 : i32
    %152 = arith.sitofp %c0_i32_69 : i32 to bf16
    %153 = vector.shape_cast %20 : vector<1x256xi1> to vector<1x256xi1>
    %154 = vector.broadcast %153 : vector<1x256xi1> to vector<2x256xi1>
    %155 = vector.broadcast %152 : bf16 to vector<2x256xbf16>
    %156 = arith.select %154, %151, %155 : vector<2x256xi1>, vector<2x256xbf16>
    %c5_70 = arith.constant 5 : index
    %c0_71 = arith.constant 0 : index
    %c0_72 = arith.constant 0 : index
    %157 = vector.load %arg4[%c5_70, %c0_71, %c0_72] : memref<9x4x2xbf16, #tpu.memory_space<vmem>>, vector<1x4x2xbf16>
    %158 = vector.shape_cast %157 : vector<1x4x2xbf16> to vector<4x2xbf16>
    %cst_73 = arith.constant dense<0.000000e+00> : vector<4x256xf32>
    %159 = tpu.matmul %158, %156, %cst_73 {dimension_numbers = #tpu.dot_dimension_numbers<[1], [0], [0], [1], [0, 0, 1, 1], [], []>} : vector<4x2xbf16>, vector<2x256xbf16>, vector<4x256xf32> -> vector<4x256xf32>
    %160 = arith.addf %150, %159 : vector<4x256xf32>
    %161 = vector.extract_strided_slice %109 {offsets = [0, 32], sizes = [2, 256], strides = [1, 1]} : vector<2x290xbf16> to vector<2x256xbf16>
    %c0_i32_74 = arith.constant 0 : i32
    %162 = arith.sitofp %c0_i32_74 : i32 to bf16
    %163 = vector.shape_cast %18 : vector<1x256xi1> to vector<1x256xi1>
    %164 = vector.broadcast %163 : vector<1x256xi1> to vector<2x256xi1>
    %165 = vector.broadcast %162 : bf16 to vector<2x256xbf16>
    %166 = arith.select %164, %161, %165 : vector<2x256xi1>, vector<2x256xbf16>
    %c6_75 = arith.constant 6 : index
    %c0_76 = arith.constant 0 : index
    %c0_77 = arith.constant 0 : index
    %167 = vector.load %arg4[%c6_75, %c0_76, %c0_77] : memref<9x4x2xbf16, #tpu.memory_space<vmem>>, vector<1x4x2xbf16>
    %168 = vector.shape_cast %167 : vector<1x4x2xbf16> to vector<4x2xbf16>
    %cst_78 = arith.constant dense<0.000000e+00> : vector<4x256xf32>
    %169 = tpu.matmul %168, %166, %cst_78 {dimension_numbers = #tpu.dot_dimension_numbers<[1], [0], [0], [1], [0, 0, 1, 1], [], []>} : vector<4x2xbf16>, vector<2x256xbf16>, vector<4x256xf32> -> vector<4x256xf32>
    %170 = arith.addf %160, %169 : vector<4x256xf32>
    %171 = vector.extract_strided_slice %109 {offsets = [0, 33], sizes = [2, 256], strides = [1, 1]} : vector<2x290xbf16> to vector<2x256xbf16>
    %c7_79 = arith.constant 7 : index
    %c0_80 = arith.constant 0 : index
    %c0_81 = arith.constant 0 : index
    %172 = vector.load %arg4[%c7_79, %c0_80, %c0_81] : memref<9x4x2xbf16, #tpu.memory_space<vmem>>, vector<1x4x2xbf16>
    %173 = vector.shape_cast %172 : vector<1x4x2xbf16> to vector<4x2xbf16>
    %cst_82 = arith.constant dense<0.000000e+00> : vector<4x256xf32>
    %174 = tpu.matmul %173, %171, %cst_82 {dimension_numbers = #tpu.dot_dimension_numbers<[1], [0], [0], [1], [0, 0, 1, 1], [], []>} : vector<4x2xbf16>, vector<2x256xbf16>, vector<4x256xf32> -> vector<4x256xf32>
    %175 = arith.addf %170, %174 : vector<4x256xf32>
    %176 = vector.extract_strided_slice %109 {offsets = [0, 34], sizes = [2, 256], strides = [1, 1]} : vector<2x290xbf16> to vector<2x256xbf16>
    %c0_i32_83 = arith.constant 0 : i32
    %177 = arith.sitofp %c0_i32_83 : i32 to bf16
    %178 = vector.shape_cast %20 : vector<1x256xi1> to vector<1x256xi1>
    %179 = vector.broadcast %178 : vector<1x256xi1> to vector<2x256xi1>
    %180 = vector.broadcast %177 : bf16 to vector<2x256xbf16>
    %181 = arith.select %179, %176, %180 : vector<2x256xi1>, vector<2x256xbf16>
    %c8_84 = arith.constant 8 : index
    %c0_85 = arith.constant 0 : index
    %c0_86 = arith.constant 0 : index
    %182 = vector.load %arg4[%c8_84, %c0_85, %c0_86] : memref<9x4x2xbf16, #tpu.memory_space<vmem>>, vector<1x4x2xbf16>
    %183 = vector.shape_cast %182 : vector<1x4x2xbf16> to vector<4x2xbf16>
    %cst_87 = arith.constant dense<0.000000e+00> : vector<4x256xf32>
    %184 = tpu.matmul %183, %181, %cst_87 {dimension_numbers = #tpu.dot_dimension_numbers<[1], [0], [0], [1], [0, 0, 1, 1], [], []>} : vector<4x2xbf16>, vector<2x256xbf16>, vector<4x256xf32> -> vector<4x256xf32>
    %185 = arith.addf %175, %184 : vector<4x256xf32>
    %c0_88 = arith.constant 0 : index
    %c0_89 = arith.constant 0 : index
    %186 = vector.load %arg5[%c0_88, %c0_89] : memref<4x1xf32, #tpu.memory_space<vmem>>, vector<4x1xf32>
    %187 = vector.broadcast %186 : vector<4x1xf32> to vector<4x256xf32>
    %188 = arith.addf %185, %187 : vector<4x256xf32>
    %cst_90 = arith.constant 0.000000e+00 : f32
    %189 = vector.broadcast %cst_90 : f32 to vector<4x256xf32>
    %190 = arith.maximumf %188, %189 : vector<4x256xf32>
    %191 = arith.addf %22, %190 : vector<4x256xf32>
    %192 = vector.shape_cast %191 : vector<4x256xf32> to vector<1x4x256xf32>
    %c0_91 = arith.constant 0 : index
    %c0_92 = arith.constant 0 : index
    %c0_93 = arith.constant 0 : index
    %193 = vector.load %arg6[%c0_91, %c0_92, %c0_93] : memref<1x4x256xf32, #tpu.memory_space<vmem>>, vector<1x4x256xf32>
    tpu.vector_store %arg6[%c0_91, %c0_92, %c0_93], %192 {strides = array<i32>} : memref<1x4x256xf32, #tpu.memory_space<vmem>>, vector<1x4x256xf32>,
    return
  }
  func.func @transform_0(%arg0: i32) -> (i32, i32, i32) {
    %c0_i32 = arith.constant 0 : i32
    %c0_i32_0 = arith.constant 0 : i32
    %c0_i32_1 = arith.constant 0 : i32
    return %arg0, %c0_i32, %c0_i32_0 : i32, i32, i32
  }
  func.func @transform_1(%arg0: i32) -> (i32, i32, i32) {
    %c0_i32 = arith.constant 0 : i32
    %c0_i32_0 = arith.constant 0 : i32
    %c0_i32_1 = arith.constant 0 : i32
    %c0_i32_2 = arith.constant 0 : i32
    return %c0_i32, %c0_i32_0, %c0_i32_1 : i32, i32, i32
  }
  func.func @transform_2(%arg0: i32) -> (i32, i32) {
    %c0_i32 = arith.constant 0 : i32
    %c0_i32_0 = arith.constant 0 : i32
    %c0_i32_1 = arith.constant 0 : i32
    return %c0_i32, %c0_i32_0 : i32, i32
  }
  func.func @transform_3(%arg0: i32) -> (i32, i32, i32) {
    %c0_i32 = arith.constant 0 : i32
    %c0_i32_0 = arith.constant 0 : i32
    %c0_i32_1 = arith.constant 0 : i32
    %c0_i32_2 = arith.constant 0 : i32
    return %c0_i32, %c0_i32_0, %c0_i32_1 : i32, i32, i32
  }
  func.func @transform_4(%arg0: i32) -> (i32, i32) {
    %c0_i32 = arith.constant 0 : i32
    %c0_i32_0 = arith.constant 0 : i32
    %c0_i32_1 = arith.constant 0 : i32
    return %c0_i32, %c0_i32_0 : i32, i32
  }
  func.func @transform_5(%arg0: i32) -> (i32, i32, i32) {
    %c0_i32 = arith.constant 0 : i32
    %c0_i32_0 = arith.constant 0 : i32
    %c0_i32_1 = arith.constant 0 : i32
    return %arg0, %c0_i32, %c0_i32_0 : i32, i32, i32
  }
}

</mosaic_0001>

<bundles_post_ra>
// kernel: tpu_custom_call.1
= control target key start
LH: loop header
LB: loop body
LE: loop exit
PB: predicated region body
PF: predicated region fallthrough
CT: control target
= control target key end

     0   :  { %10 = vsyncpa [#allocation3], 0  ;;  %s2477_s0 = inlined_call_operand.vmem [shape: f32[2,4,256], index: 0, kind: input, shape index: {}]   ;;  %s2478_s1 = inlined_call_operand.vmem [shape: bf16[9,2,4], index: 1, kind: input, shape index: {}]   ;;  %s2479_s2 = inlined_call_operand.vmem [shape: f32[2,1], index: 2, kind: input, shape index: {}]   ;;  %s2480_s3 = inlined_call_operand.vmem [shape: bf16[9,4,2], index: 3, kind: input, shape index: {}]   ;;  %s2481_s4 = inlined_call_operand.vmem [shape: f32[4,1], index: 4, kind: input, shape index: {}]   ;;  %s2482_s5 = inlined_call_operand.hbm [shape: f32[2,4,256], index: 5, kind: output, shape index: {}]  }
   0x1   :  { %12 = vsyncpa [#allocation3 + $0x1], 0  ;;  %s1703_s18 = smov 0   ;;  %s1705_s19 = smov 0  }
   0x2   :  { %s1707_s20 = smov 0   ;;  %s1709_s21 = smov 0  }
   0x3 LB: > { %s1724_s22 = sadd.s32 4294967295, %s1656_s21   ;;  %s1472_s23 = sadd.s32 4294967294, %s1656_s21   ;;  %s1656_s21 = sphi %s1709_s21, %s2706_s21   ;;  %s1652_s20 = sphi %s1707_s20, %s2705_s20   ;;  %s1648_s19 = sphi %s1705_s19, %s2704_s19   ;;  %s1644_s18 = sphi %s1703_s18, %s2703_s18  }
   0x4   : > { %s1728_s24 = sadd.s32 1, %s1656_s21   ;;  %s135_s25 = sadd.s32 1, %s1652_s20 }
   0x5   : > { %s132_s26 = ssub.s32 %s1656_s21, %s1728_s24  ;;  %p145_p0 = scmp.ne.s32.totalorder %s1652_s20, %s1648_s19 }
   0x6   : > { %p133_p1 = scmp.eq.s32.totalorder %s132_s26, 0  ;;  %p146_p2 = scmp.eq.s32.totalorder %s1724_s22, 1 }
   0x7   : > { %p151_p3 = scmp.ne.s32.totalorder %s1648_s19, %s1644_s18  ;;  %p152_p4 = scmp.eq.s32.totalorder %s1472_s23, 1 }
   0x8   : > { %s1739_s27 = scalar_select %p133_p1, %s1652_s20, %s135_s25  }
   0x9   : > { %p1741_p5 = por %p146_p2, %p145_p0  ;;  %p1745_p6 = por %p152_p4, %p151_p3 }
   0xa   : > { %p1475_p7 = scmp.ge.s32.totalorder %s1656_s21, 1  ;;  %p190_p8 = scmp.lt.s32.totalorder %s1656_s21, 3 }
   0xc   : > { %p191_p9 = pnand %p1475_p7, %p190_p8 }
   0xd   : > { %p218_p10 = scmp.lt.s32.totalorder (!%p191_p9), %s1724_s22, 1  ;;  %s1659_s10 = smov (!%p191_p9), 2  }
   0xe   : > { %194 = sbr.rel (%p191_p9) target bundleno = 1014 (0x3f6), region = 40  ;;  %s1660_s11 = smov (!%p191_p9), 16  }
   0xf   : > { %s1661_s12 = smov (!%p191_p9), 17   ;;  %s1662_s13 = smov (!%p191_p9), 18  }
  0x10   : > { %s1663_s14 = smov (!%p191_p9), 32   ;;  %s1664_s15 = smov (!%p191_p9), 127  }
  0x11   : > { %s1665_s16 = smov (!%p191_p9), 34   ;;  %s1666_s17 = smov (!%p191_p9), 126  }
  0x12   : > { %s1667_s23 = smov (!%p191_p9), 112   ;;  %s1668_s25 = smov (!%p191_p9), 111  }
  0x13   : > { %v226_v0 = vlaneseq  ;;  %v1658_v1 = vmov 0   ;;  %s219_s30 = scalar_select %p218_p10, %s1724_s22, 1  ;;  %vm2487_vm8 = vcmask 138240   ;;  %vm2490_vm10 = vcmask 1041408  }
  0x14   : > { %1592 = vset.pattern.permute.xlu0 %v1658_v1  ;;  %1593 = vset.pattern.permute.xlu1 %v1658_v1  ;;  %v1769_v20 = vunpack.c.l.b16 %v1658_v1  ;;  %v1771_v21 = vunpack.c.h.b16 %v1658_v1  ;;  %vm2483_vm11 = vcmask 15360   ;;  %v2541_v36 = vmov 0  ;;  %s1669_s26 = smov 110  }
  0x15   : > { %v227_v2 = vand.u32 127, %v226_v0  ;;  %s1536_s6 = sshll.u32 %s219_s30, 3  ;;  %v2543_v37 = vmov 0  ;;  %v2545_v45 = vmov 0  ;;  %v2547_v46 = vmov 0  ;;  %s1670_s30 = smov 96  }
  0x16   : > { %s222_s9 = scalar_lea.vmem %s2477_s0, %s1536_s6  ;;  %v2553_v57 = vmov 0  ;;  %v2555_v58 = vmov 0  ;;  %s1671_s6 = smov 95  }
  0x17   : > { %v228_v3 = vadd.s32 128, %v227_v2  ;;  %v233_v4 = vand.u32 15, %v227_v2  ;;  %v1756_v6 = vld [vmem:[%s222_s9] sm:$0xff] }
  0x18   : > { %259 = vst [vmem:[#allocation1] ss:$2 sm:$0xff] %v1756_v6 }
  0x19   : > { %v240_v5 = vand.u32 15, %v228_v3  ;;  %vm255_vm0 = vcmp.ne.s32.totalorder %v233_v4, 15  ;;  %vm253_vm1 = vcmp.ne.s32.totalorder %v233_v4, 0 }
  0x1b   : > { %vm256_vm2 = vcmp.ne.s32.totalorder %v240_v5, 15  ;;  %vm254_vm3 = vcmp.ne.s32.totalorder %v240_v5, 0  ;;  %v2561_v5 = vmov 0 }
  0x1c   : > { %vm399_vm4 = vmpackc.low %vm256_vm2, %vm255_vm0  ;;  %vm488_vm2 = vcmask 130048  }
  0x1d   : > { %v400_v7 = vsel %vm399_vm4, 65537, %v1658_v1  ;;  %vm289_vm5 = vmpackc.low %vm254_vm3, %vm253_vm1 }
  0x1e   : > { %v1759_v8 = vperm.slane %v400_v7, 0  ;;  %v290_v9 = vsel %vm289_vm5, 65537, %v1658_v1  ;;  %v402_v14 = vperm.slane %v400_v7, 4  ;;  %v2563_v7 = vmov 0 }
  0x1f   : > { %v291_v10 = vperm.slane %v290_v9, 0  ;;  %v260_v11 = vld.sshfl [vmem:[#allocation1] sm:$0xff pattern:$0x75316420]  ;;  %v1762_v16 = vperm.slane %v290_v9, 4  ;;  %v2565_v9 = vmov 0 }
  0x20   : > { %403 = vrot.lane.b32.xlu1 %v1759_v8, %s1659_s10  ;;  %v261_v12 = vld.sshfl [vmem:[#allocation1 + $0x8] sm:$0xff pattern:$0x75316420] }
  0x21   : > { %484 = vrot.lane.b32.xlu2 %v291_v10, %s1660_s11  ;;  %v264_v13 = vpack.c.bf16 %v261_v12, %v260_v11  ;;  %v293_v22 = vunpack.c.l.b16 %v291_v10  ;;  %v294_v23 = vunpack.c.h.b16 %v291_v10  ;;  %v300_v28 = vunpack.c.l.b16 %v1762_v16 }
  0x22   : > { %v301_v29 = vunpack.c.h.b16 %v1762_v16 }
  0x23   : > { %v266_v15 = vunpack.c.l.b16 %v264_v13  ;;  %v267_v18 = vunpack.c.h.b16 %v264_v13  ;;  %vm1774_vm6 = vcmp.ne.s32.totalorder %v293_v22, %v1769_v20  ;;  %vm1779_vm7 = vcmp.ne.s32.totalorder %v294_v23, %v1771_v21 }
  0x24   : > { %vm2486_vm9 = vmpackc.low %vm1779_vm7, %vm1774_vm6  ;;  %vm1803_vm12 = vcmp.ne.s32.totalorder %v300_v28, %v1769_v20  ;;  %vm1808_vm13 = vcmp.ne.s32.totalorder %v301_v29, %v1771_v21  ;;  %v2573_v28 = vmov 0  ;;  %v2575_v29 = vmov 0 }
  0x25   : > { %v268_v17 = vpack.c.b16 %v266_v15, %v266_v15  ;;  %v269_v19 = vpack.c.b16 %v267_v18, %v267_v18  ;;  %v2542_v36 = vsel %vm1803_vm12, 4294967295, %v2541_v36  ;;  %v2544_v37 = vsel %vm1808_vm13, 4294967295, %v2543_v37  ;;  %vm2485_vm14 = vmpackc.low %vm1808_vm13, %vm1803_vm12 }
  0x26   : > { %vm2522_vm13 = vcmask 1031168  }
  0x27   : > { %270 = vrot.lane.b32.xlu0 %v268_v17, %s1661_s12  ;;  %v2571_v17 = vmov 0 }
  0x28   : > { %405 = vrot.lane.b32.xlu1 %v402_v14, %s1659_s10 }
  0x29   : > { %486 = vrot.lane.b32.xlu2 %v1762_v16, %s1660_s11  ;;  %s1672_s11 = smov 94  }
  0x2f   : > { %272 = vrot.lane.b32.xlu0 %v269_v19, %s1661_s12 }
  0x30   : > { %615 = vrot.lane.b32.xlu1 %v402_v14, %s1662_s13 }
  0x31   : > { %694 = vrot.lane.b32.xlu2 %v291_v10, %s1663_s14  ;;  %v2567_v10 = vmov 0 }
  0x37   : > { %613 = vrot.lane.b32.xlu0 %v1759_v8, %s1662_s13 }
  0x7b   : > { %v485_v32 = vpop.permute.xlu2 %484 }
  0x7c   : > { %v490_v0 = vunpack.c.l.b16 %v485_v32  ;;  %v491_v1 = vunpack.c.h.b16 %v485_v32 }
  0x83   : > { %v487_v47 = vpop.permute.xlu2 %486 }
  0x84   : > { %v504_v48 = vunpack.c.l.b16 %v487_v47  ;;  %v505_v49 = vunpack.c.h.b16 %v487_v47  ;;  %v489_v59 = vsel %vm488_vm2, %v485_v32, %v487_v47  ;;  %v2579_v32 = vmov 0 }
  0x85   : > { %v497_v62 = vunpack.c.l.b16 %v489_v59  ;;  %v498_v63 = vunpack.c.h.b16 %v489_v59  ;;  %v1479_v59 = vld [vmem:[%s2478_s1 + $0x1] sm:$0x1] }
  0x86   : > { %vm1856_vm3 = vcmp.ne.s32.totalorder %v504_v48, %v1769_v20  ;;  %vm1861_vm4 = vcmp.ne.s32.totalorder %v505_v49, %v1771_v21 }
  0x92   : > { %v404_v24 = vpop.permute.xlu1 %403 }
  0x93   : > { %v409_v50 = vunpack.c.l.b16 %v404_v24  ;;  %v410_v51 = vunpack.c.h.b16 %v404_v24 }
  0x95   : > { %vm1868_vm5 = vcmp.ne.s32.totalorder %v409_v50, %v1769_v20 }
  0x96   : > { %v2554_v57 = vsel %vm1868_vm5, 4294967295, %v2553_v57 }
  0x99   : > { %v271_v27 = vpop.permute.xlu0 %270 }
  0x9a   : > { %v1790_v30 = vsel %vm2487_vm8, 0, %v271_v27  ;;  %v406_v33 = vpop.permute.xlu1 %405 }
  0x9b   : > { %314 = vrot.lane.b32.xlu2 %v1790_v30, %s1664_s15  ;;  %v307_v31 = vsel %vm2486_vm9, %v1790_v30, 0  ;;  %v408_v35 = vsel %vm2483_vm11, %v404_v24, %v406_v33  ;;  %v423_v52 = vunpack.c.l.b16 %v406_v33  ;;  %v424_v53 = vunpack.c.h.b16 %v406_v33  ;;  %vm2489_vm9 = vmpackc.low %vm1861_vm4, %vm1856_vm3  ;;  %v695_v33 = vpop.permute.xlu2 %694 }
  0x9c   : > { %v364_v34 = vsel %vm2490_vm10, %v307_v31, 0  ;;  %v416_v38 = vunpack.c.l.b16 %v408_v35  ;;  %v417_v39 = vunpack.c.h.b16 %v408_v35  ;;  %vm1873_vm11 = vcmp.ne.s32.totalorder %v410_v51, %v1771_v21 }
  0x9d   : > { %376 = vmatpush.bf16.msra.mxu2 %v364_v34  ;;  %v2556_v58 = vsel %vm1873_vm11, 4294967295, %v2555_v58  ;;  %vm2488_vm2 = vmpackc.low %vm1873_vm11, %vm1868_vm5  ;;  %vm617_vm5 = vcmask 146432   ;;  %v2577_v31 = vmov 0  ;;  %v700_v34 = vunpack.c.l.b16 %v695_v33 }
  0x9e   : > { %vm1834_vm15 = vcmp.ne.s32.totalorder %v416_v38, %v1769_v20  ;;  %vm1839_vm0 = vcmp.ne.s32.totalorder %v417_v39, %v1771_v21  ;;  %v430_v2 = vsel %vm2488_vm2, %v1790_v30, 0  ;;  %vm1921_vm2 = vcmp.ne.s32.totalorder %v497_v62, %v1769_v20 }
  0x9f   : > { %v2546_v45 = vsel %vm1834_vm15, 4294967295, %v2545_v45  ;;  %v2548_v46 = vsel %vm1839_vm0, 4294967295, %v2547_v46  ;;  %vm2484_vm1 = vmpackc.low %vm1839_vm0, %vm1834_vm15  ;;  %v2562_v5 = vsel %vm1921_vm2, 4294967295, %v2561_v5  ;;  %v701_v35 = vunpack.c.h.b16 %v695_v33 }
  0xa1   : > { %v273_v40 = vpop.permute.xlu0 %272 }
  0xa2   : > { %v1817_v41 = vsel %vm2487_vm8, %v271_v27, %v273_v40  ;;  %v1820_v42 = vsel %vm2487_vm8, %v273_v40, 0  ;;  %v2581_v40 = vmov 0 }
  0xa3   : > { %825 = vrot.lane.b32.xlu2 %v402_v14, %s1665_s16  ;;  %318 = vrot.lane.b32.xlu1 %v1820_v42, %s1664_s15  ;;  %v308_v43 = vsel %vm2485_vm14, %v1817_v41, 0  ;;  %v431_v54 = vsel %vm2484_vm1, %v1817_v41, 0  ;;  %vm1878_vm1 = vcmp.ne.s32.totalorder %v423_v52, %v1769_v20  ;;  %vm1883_vm14 = vcmp.ne.s32.totalorder %v424_v53, %v1771_v21 }
  0xa4   : > { %316 = vrot.lane.b32.xlu0 %v1817_v41, %s1664_s15  ;;  %v367_v44 = vsel %vm2490_vm10, %v308_v43, 0  ;;  %vm2491_vm8 = vmpackc.low %vm1883_vm14, %vm1878_vm1  ;;  %v513_v3 = vsel %vm2489_vm9, %v1820_v42, 0  ;;  %vm1926_vm9 = vcmp.ne.s32.totalorder %v498_v63, %v1771_v21  ;;  %vm1931_vm10 = vcmp.ne.s32.totalorder %v490_v0, %v1769_v20 }
  0xa5   : > { %389 = vmatpush.bf16.msra.mxu3 %v367_v44  ;;  %v432_v4 = vsel %vm2491_vm8, %v1820_v42, 0  ;;  %v2564_v7 = vsel %vm1926_vm9, 4294967295, %v2563_v7  ;;  %v2566_v9 = vsel %vm1931_vm10, 4294967295, %v2565_v9  ;;  %vm1936_vm8 = vcmp.ne.s32.totalorder %v491_v1, %v1771_v21  ;;  %vm2496_vm15 = vmpackc.low %vm1926_vm9, %vm1921_vm2 }
  0xa6   : > { %v2568_v10 = vsel %vm1936_vm8, 4294967295, %v2567_v10  ;;  %vm2497_vm0 = vmpackc.low %vm1936_vm8, %vm1931_vm10  ;;  %v512_v14 = vsel %vm2496_vm15, %v1817_v41, 0  ;;  %v2583_v43 = vmov 0 }
  0xa7   : > { %v511_v15 = vsel %vm2497_vm0, %v1790_v30, 0 }
  0xa9   : > { %v614_v13 = vpop.permute.xlu0 %613 }
  0xaa   : > { %v619_v23 = vunpack.c.l.b16 %v614_v13  ;;  %v620_v24 = vunpack.c.h.b16 %v614_v13 }
  0xab   : > { %823 = vrot.lane.b32.xlu1 %v1759_v8, %s1665_s16  ;;  %440 = vrot.lane.b32.xlu2 %v431_v54, %s1666_s17  ;;  %v616_v8 = vpop.permute.xlu1 %615 }
  0xac   : > { %696 = vrot.lane.b32.xlu0 %v1762_v16, %s1663_s14  ;;  %v633_v11 = vunpack.c.l.b16 %v616_v8  ;;  %v634_v12 = vunpack.c.h.b16 %v616_v8  ;;  %v2569_v16 = vmov 0  ;;  %v618_v18 = vsel %vm617_vm5, %v614_v13, %v616_v8 }
  0xad   : > { %v626_v19 = vunpack.c.l.b16 %v618_v18  ;;  %v627_v22 = vunpack.c.h.b16 %v618_v18  ;;  %vm2005_vm9 = vcmp.ne.s32.totalorder %v620_v24, %v1771_v21  ;;  %v2587_v13 = vmov 0 }
  0xae   : > { %vm1965_vm11 = vcmp.ne.s32.totalorder %v633_v11, %v1769_v20  ;;  %vm1970_vm15 = vcmp.ne.s32.totalorder %v634_v12, %v1771_v21  ;;  %v2580_v32 = vsel %vm2005_vm9, 4294967295, %v2579_v32  ;;  %v2591_v18 = vmov 0 }
  0xaf   : > { %v2570_v16 = vsel %vm1965_vm11, 4294967295, %v2569_v16  ;;  %v2572_v17 = vsel %vm1970_vm15, 4294967295, %v2571_v17  ;;  %vm2499_vm0 = vmpackc.low %vm1970_vm15, %vm1965_vm11  ;;  %vm1990_vm5 = vcmp.ne.s32.totalorder %v626_v19, %v1769_v20  ;;  %vm1995_vm2 = vcmp.ne.s32.totalorder %v627_v22, %v1771_v21 }
  0xb0   : > { %v642_v27 = vsel %vm2499_vm0, %v1820_v42, 0  ;;  %v2574_v28 = vsel %vm1990_vm5, 4294967295, %v2573_v28  ;;  %v2576_v29 = vsel %vm1995_vm2, 4294967295, %v2575_v29  ;;  %vm2000_vm0 = vcmp.ne.s32.totalorder %v619_v23, %v1769_v20  ;;  %vm2505_vm10 = vmpackc.low %vm1995_vm2, %vm1990_vm5 }
  0xb1   : > { %v2578_v31 = vsel %vm2000_vm0, 4294967295, %v2577_v31  ;;  %vm2506_vm8 = vmpackc.low %vm2005_vm9, %vm2000_vm0  ;;  %v641_v38 = vsel %vm2505_vm10, %v1817_v41, 0  ;;  %vm2032_vm11 = vcmp.ne.s32.totalorder %v700_v34, %v1769_v20  ;;  %vm2037_vm15 = vcmp.ne.s32.totalorder %v701_v35, %v1771_v21 }
  0xb2   : > { %v640_v39 = vsel %vm2506_vm8, %v1790_v30, 0  ;;  %v2582_v40 = vsel %vm2032_vm11, 4294967295, %v2581_v40  ;;  %v2584_v43 = vsel %vm2037_vm15, 4294967295, %v2583_v43  ;;  %vm2508_vm10 = vmpackc.low %vm2037_vm15, %vm2032_vm11  ;;  %vm2511_vm8 = vcmask 1039360  }
  0xb3   : > { %438 = vrot.lane.b32.xlu1 %v430_v2, %s1666_s17  ;;  %523 = vrot.lane.b32.xlu2 %v513_v3, %s1667_s23  ;;  %v721_v44 = vsel %vm2508_vm10, %v1790_v30, 0  ;;  %vm2585_vm5 = vcmask 1041408   ;;  %vm2518_vm2 = vcmask 31744   ;;  %vm698_vm0 = vcmask 261120  }
  0xb4   : > { %442 = vrot.lane.b32.xlu0 %v432_v4, %s1666_s17  ;;  %vm2586_vm10 = vmmov %vm2585_vm5  ;;  %v2595_v22 = vmov 0  ;;  %v2597_v23 = vmov 0 }
  0xbb   : > { %521 = vrot.lane.b32.xlu1 %v512_v14, %s1667_s23  ;;  %571 = vrot.lane.b32.xlu2 %v1820_v42, %s1668_s25  ;;  %v309_v14 = vld [vmem:[%s2478_s1] sm:$0x1] }
  0xbc   : > { %519 = vrot.lane.b32.xlu0 %v511_v15, %s1667_s23  ;;  %v2589_v15 = vmov 0  ;;  %1482 = vmatmul.msk.bf16.vlgmr.msra.gmra.mxu2 %vm2518_vm2, %v309_v14 }
  0xbd   : > { %1483 = vmatmul.msk.bf16.vlgmr.msra.gmra.mxu3 %vm2518_vm2, %v309_v14 }
  0xc3   : > { %569 = vrot.lane.b32.xlu1 %v1817_v41, %s1668_s25  ;;  %652 = vrot.lane.b32.xlu2 %v642_v27, %s1669_s26 }
  0xc4   : > { %567 = vrot.lane.b32.xlu0 %v1790_v30, %s1668_s25 }
  0xcb   : > { %650 = vrot.lane.b32.xlu1 %v641_v38, %s1669_s26 }
  0xcc   : > { %648 = vrot.lane.b32.xlu0 %v640_v39, %s1669_s26 }
  0xd4   : > { %729 = vrot.lane.b32.xlu0 %v721_v44, %s1670_s30 }
  0xdc   : > { %777 = vrot.lane.b32.xlu0 %v1790_v30, %s1671_s6 }
  0xf5   : > { %v315_v47 = vpop.permute.xlu2 %314 }
  0xfd   : > { %v2054_v48 = vpop.permute.xlu2 %825 }
 0x105   : > { %v441_v2 = vpop.permute.xlu2 %440 }
 0x115   : > { %v319_v49 = vpop.permute.xlu1 %318 }
 0x116   : > { %v317_v50 = vpop.permute.xlu0 %316 }
 0x117   : > { %v321_v51 = vsel %vm2511_vm8, %v315_v47, %v317_v50  ;;  %v322_v52 = vsel %vm2511_vm8, %v317_v50, %v319_v49  ;;  %v524_v49 = vpop.permute.xlu2 %523  ;;  %v843_v50 = vunpack.c.l.b16 %v2054_v48 }
 0x118   : > { %v329_v53 = vsel %vm2585_vm5, %v321_v51, 0  ;;  %v332_v54 = vsel %vm2586_vm10, %v322_v52, 0  ;;  %v844_v51 = vunpack.c.h.b16 %v2054_v48 }
 0x119   : > { %341 = vmatpush.bf16.msra.mxu0 %v329_v53  ;;  %354 = vmatpush.bf16.msra.mxu1 %v332_v54 }
 0x11c   : > { %1480 = vmatmul.msk.bf16.vlgmr.msra.gmra.mxu0 %vm2518_vm2, %v1479_v59  ;;  %1481 = vmatmul.msk.bf16.vlgmr.msra.gmra.mxu1 %vm2518_vm2, %v1479_v59  ;;  %vm827_vm2 = vcmask 277504  }
 0x11d   : > { %v824_v62 = vpop.permute.xlu1 %823 }
 0x11e   : > { %v829_v63 = vunpack.c.l.b16 %v824_v62  ;;  %v830_v0 = vunpack.c.h.b16 %v824_v62  ;;  %v697_v1 = vpop.permute.xlu0 %696  ;;  %v828_v44 = vsel %vm827_vm2, %v824_v62, %v2054_v48  ;;  %vm2151_vm2 = vcmp.ne.s32.totalorder %v844_v51, %v1771_v21  ;;  %v904_v51 = vld [vmem:[%s2479_s2] sm:$0x3] }
 0x11f   : > { %v699_v3 = vsel %vm698_vm0, %v695_v33, %v697_v1  ;;  %v714_v4 = vunpack.c.l.b16 %v697_v1  ;;  %v715_v12 = vunpack.c.h.b16 %v697_v1  ;;  %v836_v52 = vunpack.c.l.b16 %v828_v44 }
 0x120   : > { %v707_v8 = vunpack.c.l.b16 %v699_v3  ;;  %v708_v11 = vunpack.c.h.b16 %v699_v3  ;;  %vm2066_vm10 = vcmp.ne.s32.totalorder %v829_v63, %v1769_v20  ;;  %vm2074_vm5 = vcmp.ne.s32.totalorder %v830_v0, %v1771_v21  ;;  %v1484_v0 = vld [vmem:[%s2478_s1 + $0x2] sm:$0x1] }
 0x121   : > { %v2588_v13 = vsel %vm2066_vm10, 4294967295, %v2587_v13  ;;  %v2590_v15 = vsel %vm2074_vm5, 4294967295, %v2589_v15  ;;  %vm2079_vm0 = vcmp.ne.s32.totalorder %v714_v4, %v1769_v20  ;;  %vm2517_vm8 = vmpackc.low %vm2074_vm5, %vm2066_vm10  ;;  %vm2089_vm9 = vcmp.ne.s32.totalorder %v715_v12, %v1771_v21 }
 0x122   : > { %v2592_v18 = vsel %vm2079_vm0, 4294967295, %v2591_v18  ;;  %vm2094_vm11 = vcmp.ne.s32.totalorder %v707_v8, %v1769_v20  ;;  %vm2099_vm15 = vcmp.ne.s32.totalorder %v708_v11, %v1771_v21  ;;  %v850_v24 = vsel %vm2517_vm8, %v1790_v30, 0  ;;  %vm2519_vm12 = vmpackc.low %vm2089_vm9, %vm2079_vm0  ;;  %v1487_v11 = vld [vmem:[%s2478_s1 + $0x3] sm:$0x1] }
 0x123   : > { %v2596_v22 = vsel %vm2094_vm11, 4294967295, %v2595_v22  ;;  %v2598_v23 = vsel %vm2099_vm15, 4294967295, %v2597_v23  ;;  %858 = vrot.lane.b32.xlu0 %v850_v24, %s1672_s11  ;;  %v723_v27 = vsel %vm2519_vm12, %v1820_v42, 0  ;;  %vm2521_vm8 = vmpackc.low %vm2099_vm15, %vm2094_vm11  ;;  %vm2599_vm12 = vcmask 1041408  }
 0x124   : > { %733 = vrot.lane.b32.xlu2 %v723_v27, %s1670_s30  ;;  %v722_v30 = vsel %vm2521_vm8, %v1817_v41, 0  ;;  %vm2600_vm10 = vmmov %vm2599_vm12  ;;  %v837_v53 = vunpack.c.h.b16 %v828_v44  ;;  %vm2527_vm8 = vcmask 916480   ;;  %v2605_v3 = vmov 0 }
 0x125   : > { %v439_v33 = vpop.permute.xlu1 %438  ;;  %731 = vrot.lane.b32.xlu1 %v722_v30, %s1670_s30  ;;  %v2607_v4 = vmov 0  ;;  %vm2609_vm11 = vcmask 31744   ;;  %vm2611_vm0 = vmmov %vm2600_vm10 }
 0x126   : > { %v443_v34 = vpop.permute.xlu0 %442  ;;  %v445_v35 = vsel %vm2522_vm13, %v439_v33, %v441_v2  ;;  %vm2166_vm5 = vcmp.ne.s32.totalorder %v837_v53, %v1771_v21  ;;  %vm2610_vm15 = vmmov %vm2609_vm11 }
 0x127   : > { %v451_v38 = vsel %vm2599_vm12, %v445_v35, 0  ;;  %v446_v39 = vsel %vm2522_vm13, %v441_v2, %v443_v34  ;;  %vm2146_vm12 = vcmp.ne.s32.totalorder %v843_v50, %v1769_v20  ;;  %vm2161_vm13 = vcmp.ne.s32.totalorder %v836_v52, %v1769_v20  ;;  %v572_v20 = vpop.permute.xlu2 %571  ;;  %v1490_v34 = vld [vmem:[%s2478_s1 + $0x4] sm:$0x1]  ;;  %v1493_v50 = vld [vmem:[%s2478_s1 + $0x5] sm:$0x1] }
 0x128   : > { %463 = vmatpush.bf16.msrb.mxu0 %v451_v38  ;;  %v454_v47 = vsel %vm2600_vm10, %v446_v39, 0  ;;  %v2606_v3 = vsel %vm2161_vm13, 4294967295, %v2605_v3  ;;  %v2608_v4 = vsel %vm2166_vm5, 4294967295, %v2607_v4 }
 0x129   : > { %476 = vmatpush.bf16.msrb.mxu1 %v454_v47 }
 0x12b   : > { %907 = vperm.xlu0 %1592, %v904_v51  }
 0x12c   : > { %781 = vrot.lane.b32.xlu2 %v1820_v42, %s1671_s6  ;;  %1485 = vmatmul.msk.bf16.vlgmr.msrb.gmra.mxu0 %vm2609_vm11, %v1484_v0  ;;  %vm2529_vm11 = vmpackc.low %vm2166_vm5, %vm2161_vm13 }
 0x12d   : > { %v522_v54 = vpop.permute.xlu1 %521  ;;  %779 = vrot.lane.b32.xlu1 %v1817_v41, %s1671_s6  ;;  %1486 = vmatmul.msk.bf16.vlgmr.msrb.gmra.mxu1 %vm2610_vm15, %v1484_v0  ;;  %vm2530_vm15 = vcmask 908288   ;;  %v851_v12 = vsel %vm2529_vm11, %v1817_v41, 0 }
 0x12e   : > { %v520_v59 = vpop.permute.xlu0 %519  ;;  %v527_v62 = vsel %vm2527_vm8, %v522_v54, %v524_v49 }
 0x12f   : > { %v526_v1 = vsel %vm2527_vm8, %v520_v59, %v522_v54  ;;  %v535_v2 = vsel %vm2600_vm10, %v527_v62, 0  ;;  %vm2528_vm10 = vmpackc.low %vm2151_vm2, %vm2146_vm12  ;;  %vm2612_vm8 = vcmask 31744   ;;  %v653_v41 = vpop.permute.xlu2 %652 }
 0x130   : > { %v532_v8 = vsel %vm2611_vm0, %v526_v1, 0  ;;  %557 = vmatpush.bf16.msrb.mxu3 %v535_v2  ;;  %v852_v21 = vsel %vm2528_vm10, %v1820_v42, 0  ;;  %vm2613_vm0 = vmmov %vm2612_vm8  ;;  %vm654_vm10 = vcmask 900096  }
 0x131   : > { %544 = vmatpush.bf16.msrb.mxu2 %v532_v8 }
 0x133   : > { %1489 = vmatmul.msk.bf16.vlgmr.msrb.gmra.mxu3 %vm2612_vm8, %v1487_v11  ;;  %vm2614_vm8 = vcmask 1041408  }
 0x134   : > { %1488 = vmatmul.msk.bf16.vlgmr.msrb.gmra.mxu2 %vm2613_vm0, %v1487_v11  ;;  %862 = vrot.lane.b32.xlu2 %v852_v21, %s1672_s11  ;;  %vm2615_vm0 = vmmov %vm2614_vm8  ;;  %v1496_v11 = vld [vmem:[%s2478_s1 + $0x6] sm:$0x1] }
 0x135   : > { %v570_v14 = vpop.permute.xlu1 %569  ;;  %860 = vrot.lane.b32.xlu1 %v851_v12, %s1672_s11  ;;  %vm2616_vm11 = vmmov %vm2615_vm0 }
 0x136   : > { %v575_v24 = vsel %vm2530_vm15, %v570_v14, %v572_v20  ;;  %v568_v27 = vpop.permute.xlu0 %567 }
 0x137   : > { %v583_v30 = vsel %vm2614_vm8, %v575_v24, 0  ;;  %v574_v42 = vsel %vm2530_vm15, %v568_v27, %v570_v14  ;;  %vm2617_vm8 = vcmask 31744  }
 0x138   : > { %v580_v33 = vsel %vm2615_vm0, %v574_v42, 0  ;;  %605 = vmatpush.bf16.msra.mxu1 %v583_v30  ;;  %vm2618_vm15 = vmmov %vm2617_vm8 }
 0x139   : > { %592 = vmatpush.bf16.msra.mxu0 %v580_v33  ;;  %vm2619_vm13 = vmmov %vm2617_vm8 }
 0x13a   : > { %vm2620_vm5 = vmmov %vm2617_vm8 }
 0x13c   : > { %1491 = vmatmul.msk.bf16.vlgmr.msra.gmra.mxu0 %vm2617_vm8, %v1490_v34  ;;  %vm2623_vm8 = vmmov %vm2620_vm5 }
 0x13d   : > { %v651_v35 = vpop.permute.xlu1 %650  ;;  %1492 = vmatmul.msk.bf16.vlgmr.msra.gmra.mxu1 %vm2618_vm15, %v1490_v34  ;;  %vm2621_vm15 = vmmov %vm2615_vm0  ;;  %v1499_v34 = vld [vmem:[%s2478_s1 + $0x7] sm:$0x1] }
 0x13e   : > { %v656_v38 = vsel %vm654_vm10, %v651_v35, %v653_v41  ;;  %v649_v39 = vpop.permute.xlu0 %648 }
 0x13f   : > { %v664_v44 = vsel %vm2616_vm11, %v656_v38, 0  ;;  %v655_v47 = vsel %vm654_vm10, %v649_v39, %v651_v35  ;;  %vm735_vm11 = vcmask 785408   ;;  %v378_v41 = vpop.f32.mrf.mxu2 }
 0x140   : > { %v661_v49 = vsel %vm2615_vm0, %v655_v47, 0  ;;  %686 = vmatpush.bf16.msra.mxu3 %v664_v44  ;;  %v391_v38 = vpop.f32.mrf.mxu3 }
 0x141   : > { %673 = vmatpush.bf16.msra.mxu2 %v661_v49 }
 0x143   : > { %1495 = vmatmul.msk.bf16.vlgmr.msra.gmra.mxu3 %vm2619_vm13, %v1493_v50  ;;  %vm2622_vm13 = vmmov %vm2615_vm0  ;;  %vm2533_vm0 = vcmask 777216  }
 0x144   : > { %1494 = vmatmul.msk.bf16.vlgmr.msra.gmra.mxu2 %vm2620_vm5, %v1493_v50 }
 0x146   : > { %v730_v53 = vpop.permute.xlu0 %729 }
 0x14e   : > { %v778_v21 = vpop.permute.xlu0 %777 }
 0x17e   : > { %v734_v52 = vpop.permute.xlu2 %733 }
 0x186   : > { %v782_v20 = vpop.permute.xlu2 %781 }
 0x18e   : > { %v863_v44 = vpop.permute.xlu2 %862 }
 0x195   : > { %v859_v47 = vpop.permute.xlu0 %858 }
 0x197   : > { %v732_v54 = vpop.permute.xlu1 %731 }
 0x198   : > { %v736_v59 = vsel %vm735_vm11, %v730_v53, %v732_v54  ;;  %v737_v62 = vsel %vm735_vm11, %v732_v54, %v734_v52  ;;  %v1502_v54 = vld [vmem:[%s2478_s1 + $0x8] sm:$0x1] }
 0x199   : > { %v343_v0 = vpop.f32.mrf.mxu0  ;;  %v356_v1 = vpop.f32.mrf.mxu1  ;;  %v742_v2 = vsel %vm2621_vm15, %v736_v59, 0  ;;  %v745_v8 = vsel %vm2622_vm13, %v737_v62, 0  ;;  %vm2624_vm15 = vmmov %vm2622_vm13 }
 0x19a   : > { %754 = vmatpush.bf16.msrb.mxu0 %v742_v2  ;;  %767 = vmatpush.bf16.msrb.mxu1 %v745_v8  ;;  %v379_v35 = vadd.f32 %v378_v41, %v343_v0  ;;  %v392_v39 = vadd.f32 %v391_v38, %v356_v1  ;;  %v380_v59 = vpop.f32.mrf.mxu2  ;;  %v393_v0 = vpop.f32.mrf.mxu3 }
 0x19d   : > { %1497 = vmatmul.msk.bf16.vlgmr.msrb.gmra.mxu0 %vm2620_vm5, %v1496_v11  ;;  %1498 = vmatmul.msk.bf16.vlgmr.msrb.gmra.mxu1 %vm2623_vm8, %v1496_v11  ;;  %vm2625_vm8 = vmmov %vm2620_vm5 }
 0x19f   : > { %v780_v12 = vpop.permute.xlu1 %779 }
 0x1a0   : > { %v784_v14 = vsel %vm2533_vm0, %v778_v21, %v780_v12  ;;  %v785_v24 = vsel %vm2533_vm0, %v780_v12, %v782_v20  ;;  %vm2534_vm0 = vcmask 769024  }
 0x1a1   : > { %v345_v27 = vpop.f32.mrf.mxu0  ;;  %v358_v30 = vpop.f32.mrf.mxu1  ;;  %v790_v42 = vsel %vm2624_vm15, %v784_v14, 0  ;;  %v793_v33 = vsel %vm2622_vm13, %v785_v24, 0  ;;  %vm2626_vm15 = vmmov %vm2622_vm13 }
 0x1a2   : > { %802 = vmatpush.bf16.msrb.mxu2 %v790_v42  ;;  %815 = vmatpush.bf16.msrb.mxu3 %v793_v33 }
 0x1a5   : > { %1500 = vmatmul.msk.bf16.vlgmr.msrb.gmra.mxu2 %vm2620_vm5, %v1499_v34  ;;  %1501 = vmatmul.msk.bf16.vlgmr.msrb.gmra.mxu3 %vm2625_vm8, %v1499_v34  ;;  %vm2627_vm8 = vmmov %vm2620_vm5 }
 0x1a7   : > { %v861_v49 = vpop.permute.xlu1 %860 }
 0x1a8   : > { %v865_v50 = vsel %vm2534_vm0, %v859_v47, %v861_v49  ;;  %v866_v51 = vsel %vm2534_vm0, %v861_v49, %v863_v44 }
 0x1a9   : > { %v871_v52 = vsel %vm2626_vm15, %v865_v50, 0  ;;  %v874_v53 = vsel %vm2622_vm13, %v866_v51, 0  ;;  %v465_v62 = vpop.f32.mrf.mxu0  ;;  %vm2628_vm15 = vcmask 138240   ;;  %vm2629_vm13 = vmpackc.low %vm1883_vm14, %vm1878_vm1  ;;  %vm2634_vm1 = vnez %v2544_v37 }
 0x1aa   : > { %883 = vmatpush.bf16.msra.mxu0 %v871_v52  ;;  %896 = vmatpush.bf16.msra.mxu1 %v874_v53  ;;  %v482_v1 = vadd.f32 %v465_v62, %v379_v35  ;;  %v478_v2 = vpop.f32.mrf.mxu1  ;;  %vm2633_vm14 = vmpackc.low %vm1779_vm7, %vm1774_vm6  ;;  %vm2639_vm7 = vnez %v2556_v58 }
 0x1ab   : > { %v483_v8 = vadd.f32 %v478_v2, %v392_v39 }
 0x1ad   : > { %1503 = vmatmul.msk.bf16.vlgmr.msra.gmra.mxu0 %vm2620_vm5, %v1502_v54  ;;  %1504 = vmatmul.msk.bf16.vlgmr.msra.gmra.mxu1 %vm2627_vm8, %v1502_v54  ;;  %vm951_vm5 = vcmask 1040384   ;;  %vm2630_vm8 = vmmov %vm2628_vm15 }
 0x1ae   : > { %vm2631_vm0 = vmmov %vm2630_vm8 }
 0x1b1   : > { %v467_v11 = vpop.f32.mrf.mxu0 }
 0x1b2   : > { %v480_v20 = vpop.f32.mrf.mxu1 }
 0x1b3   : > { %v908_v20 = vpop.permute.xlu0 %907 }
 0x1b6   : > { %v559_v21 = vpop.f32.mrf.mxu3 }
 0x1b7   : > { %v546_v12 = vpop.f32.mrf.mxu2  ;;  %v564_v14 = vadd.f32 %v559_v21, %v483_v8 }
 0x1b8   : > { %v563_v24 = vadd.f32 %v546_v12, %v482_v1 }
 0x1b9   : > { %v594_v27 = vpop.f32.mrf.mxu0 }
 0x1ba   : > { %v611_v30 = vadd.f32 %v594_v27, %v563_v24  ;;  %v607_v42 = vpop.f32.mrf.mxu1 }
 0x1bb   : > { %v612_v34 = vadd.f32 %v607_v42, %v564_v14 }
 0x1be   : > { %v561_v33 = vpop.f32.mrf.mxu3 }
 0x1bf   : > { %v548_v41 = vpop.f32.mrf.mxu2 }
 0x1c1   : > { %v596_v38 = vpop.f32.mrf.mxu0 }
 0x1c2   : > { %v609_v35 = vpop.f32.mrf.mxu1 }
 0x1c6   : > { %v688_v44 = vpop.f32.mrf.mxu3 }
 0x1c7   : > { %v675_v47 = vpop.f32.mrf.mxu2  ;;  %v693_v49 = vadd.f32 %v688_v44, %v612_v34 }
 0x1c8   : > { %v692_v50 = vadd.f32 %v675_v47, %v611_v30 }
 0x1ce   : > { %v690_v51 = vpop.f32.mrf.mxu3 }
 0x1cf   : > { %v677_v39 = vpop.f32.mrf.mxu2 }
 0x21a   : > { %v756_v52 = vpop.f32.mrf.mxu0  ;;  %v769_v53 = vpop.f32.mrf.mxu1 }
 0x21b   : > { %v773_v62 = vadd.f32 %v756_v52, %v692_v50  ;;  %v774_v0 = vadd.f32 %v769_v53, %v693_v49 }
 0x222   : > { %v758_v54 = vpop.f32.mrf.mxu0  ;;  %v771_v59 = vpop.f32.mrf.mxu1 }
 0x228   : > { %v804_v1 = vpop.f32.mrf.mxu2  ;;  %v817_v2 = vpop.f32.mrf.mxu3 }
 0x229   : > { %v821_v8 = vadd.f32 %v804_v1, %v773_v62  ;;  %v822_v11 = vadd.f32 %v817_v2, %v774_v0 }
 0x22a   : > { %v885_v21 = vpop.f32.mrf.mxu0  ;;  %v898_v12 = vpop.f32.mrf.mxu1 }
 0x22b   : > { %v902_v14 = vadd.f32 %v885_v21, %v821_v8  ;;  %v903_v24 = vadd.f32 %v898_v12, %v822_v11 }
 0x22d   : > { %v910_v27 = vadd.f32 %v908_v20, %v902_v14  ;;  %v911_v42 = vadd.f32 %v908_v20, %v903_v24  ;;  %v1510_v14 = vld [vmem:[%s2480_s3 + $0x4] sm:$0x3] }
 0x22f   : > { %v912_v30 = vmax.f32 %v910_v27, 0.0  ;;  %v913_v33 = vmax.f32 %v911_v42, 0.0 }
 0x230   : > { %v806_v34 = vpop.f32.mrf.mxu2  ;;  %v819_v41 = vpop.f32.mrf.mxu3 }
 0x231   : > { %v914_v38 = vpack.c.bf16 %v913_v33, %v912_v30 }
 0x232   : > { %v887_v35 = vpop.f32.mrf.mxu0  ;;  %v900_v44 = vpop.f32.mrf.mxu1 }
 0x233   : > { %v917_v47 = vunpack.c.h.b16 %v914_v38  ;;  %v916_v49 = vunpack.c.l.b16 %v914_v38  ;;  %v1513_v38 = vld [vmem:[%s2480_s3 + $0x6] sm:$0x3] }
 0x235   : > { %v919_v50 = vpack.c.b16 %v917_v47, %v917_v47  ;;  %v918_v51 = vpack.c.b16 %v916_v49, %v916_v49 }
 0x237   : > { %922 = vrot.lane.b32.xlu2 %v919_v50, %s1661_s12  ;;  %920 = vrot.lane.b32.xlu1 %v918_v51, %s1661_s12 }
 0x291   : > { %v923_v39 = vpop.permute.xlu2 %922 }
 0x292   : > { %v930_v52 = vsel %vm2628_vm15, %v923_v39, 0  ;;  %vm2632_vm15 = vmpackc.low %vm1861_vm4, %vm1856_vm3  ;;  %vm2637_vm3 = vnez %v2592_v18  ;;  %vm2640_vm4 = vnez %v2554_v57  ;;  %v1505_v18 = vld [vmem:[%s2480_s3 + $0x2] sm:$0x3] }
 0x293   : > { %943 = vrot.lane.b32.xlu2 %v930_v52, %s1664_s15  ;;  %v1021_v53 = vsel %vm2629_vm13, %v930_v52, 0  ;;  %v1074_v61 = vsel %vm2632_vm15, %v930_v52, 0  ;;  %vm2638_vm6 = vmpackc.low %vm2089_vm9, %vm2637_vm3  ;;  %vm2642_vm15 = vnez %v2548_v46  ;;  %vm2645_vm9 = vnez %v2572_v17  ;;  %v934_v17 = vld [vmem:[%s2480_s3] sm:$0x3] }
 0x294   : > { %v1227_v25 = vsel %vm2638_vm6, %v930_v52, 0  ;;  %vm2648_vm3 = vmpackc.low %vm2151_vm2, %vm2146_vm12  ;;  %vm2649_vm6 = vnez %v2568_v10  ;;  %vm2655_vm12 = vnez %v2584_v43  ;;  %vm2656_vm2 = vnez %v2582_v40 }
 0x29b   : > { %1031 = vrot.lane.b32.xlu2 %v1021_v53, %s1666_s17  ;;  %v1378_v53 = vld [vmem:[%s2481_s4] sm:$0xf] }
 0x2a3   : > { %1131 = vrot.lane.b32.xlu2 %v930_v52, %s1668_s25 }
 0x2a9   : > { %v921_v54 = vpop.permute.xlu1 %920 }
 0x2aa   : > { %v924_v59 = vsel %vm2630_vm8, %v921_v54, %v923_v39  ;;  %v927_v62 = vsel %vm2631_vm0, 0, %v921_v54  ;;  %vm2635_vm0 = vnez %v2542_v36  ;;  %vm2641_vm8 = vmpackc.low %vm2639_vm7, %vm2640_vm4  ;;  %vm2650_vm7 = vnez %v2566_v9  ;;  %v1516_v39 = vld [vmem:[%s2480_s3 + $0x8] sm:$0x3] }
 0x2ab   : > { %1084 = vrot.lane.b32.xlu2 %v1074_v61, %s1667_s23  ;;  %939 = vrot.lane.b32.xlu0 %v927_v62, %s1664_s15  ;;  %v932_v60 = vsel %vm2633_vm14, %v927_v62, 0  ;;  %vm2636_vm13 = vmpackc.low %vm2634_vm1, %vm2635_vm0  ;;  %v1019_v26 = vsel %vm2641_vm8, %v927_v62, 0  ;;  %vm2643_vm14 = vnez %v2546_v45  ;;  %vm2646_vm0 = vnez %v2570_v16 }
 0x2ac   : > { %v933_v56 = vsel %vm2636_vm13, %v924_v59, 0  ;;  %941 = vrot.lane.b32.xlu1 %v924_v59, %s1664_s15  ;;  %v988_v55 = vsel %vm951_vm5, %v932_v60, 0  ;;  %vm2644_vm1 = vmpackc.low %vm2642_vm15, %vm2643_vm14  ;;  %v1327_v45 = vsel %vm2648_vm3, %v930_v52, 0  ;;  %vm2652_vm8 = vnez %v2564_v7  ;;  %s1614_s15 = scalar_lea.hbm %s2482_s5, 16 }
 0x2ad   : > { %v991_v0 = vsel %vm951_vm5, %v933_v56, 0  ;;  %1000 = vmatpush.bf16.msrb.mxu0 %v988_v55  ;;  %v1020_v36 = vsel %vm2644_vm1, %v924_v59, 0  ;;  %vm2647_vm13 = vmpackc.low %vm2645_vm9, %vm2646_vm0  ;;  %vm2653_vm15 = vnez %v2562_v5  ;;  %vm2658_vm9 = vnez %v2598_v23  ;;  %v1519_v55 = vld [vmem:[%s2480_s3 + $0xa] sm:$0x3] }
 0x2ae   : > { %1013 = vmatpush.bf16.msrb.mxu1 %v991_v0  ;;  %v1174_v37 = vsel %vm2647_vm13, %v930_v52, 0  ;;  %vm2651_vm4 = vmpackc.low %vm2649_vm6, %vm2650_vm7  ;;  %vm2659_vm0 = vnez %v2596_v22  ;;  %vm2661_vm3 = vnez %v2580_v32  ;;  %vm2662_vm6 = vnez %v2578_v31 }
 0x2af   : > { %v1072_v46 = vsel %vm2651_vm4, %v927_v62, 0  ;;  %vm2654_vm14 = vmpackc.low %vm2652_vm8, %vm2653_vm15  ;;  %vm2664_vm4 = vnez %v2576_v29  ;;  %vm2665_vm8 = vnez %v2574_v28 }
 0x2b0   : > { %v1073_v57 = vsel %vm2654_vm14, %v924_v59, 0  ;;  %vm2657_vm1 = vmpackc.low %vm2655_vm12, %vm2656_vm2  ;;  %vm2667_vm14 = vnez %v2590_v15  ;;  %vm2668_vm12 = vnez %v2588_v13 }
 0x2b1   : > { %v1225_v58 = vsel %vm2657_vm1, %v927_v62, 0  ;;  %vm2660_vm13 = vmpackc.low %vm2658_vm9, %vm2659_vm0  ;;  %vm2670_vm1 = vnez %v2608_v4  ;;  %vm2671_vm9 = vnez %v2606_v3 }
 0x2b2   : > { %v1226_v5 = vsel %vm2660_vm13, %v924_v59, 0  ;;  %vm2663_vm7 = vmpackc.low %vm2661_vm3, %vm2662_vm6  ;;  %vm2673_vm13 = vcmask 15360   ;;  %vm2675_vm6 = vcmask 1039360  }
 0x2b3   : > { %1237 = vrot.lane.b32.xlu2 %v1227_v25, %s1670_s30  ;;  %1027 = vrot.lane.b32.xlu0 %v1019_v26, %s1666_s17  ;;  %v1172_v7 = vsel %vm2663_vm7, %v927_v62, 0  ;;  %vm2666_vm15 = vmpackc.low %vm2664_vm4, %vm2665_vm8 }
 0x2b4   : > { %1029 = vrot.lane.b32.xlu1 %v1020_v36, %s1666_s17  ;;  %v1173_v9 = vsel %vm2666_vm15, %v924_v59, 0  ;;  %vm2669_vm2 = vmpackc.low %vm2667_vm14, %vm2668_vm12  ;;  %1508 = vmatmul.msk.bf16.vlgmr.msrb.gmra.mxu0 %vm2673_vm13, %v934_v17  ;;  %vm2679_vm15 = vcmask 1031168   ;;  %vm2681_vm12 = vcmask 908288  }
 0x2b5   : > { %v1325_v10 = vsel %vm2669_vm2, %v927_v62, 0  ;;  %vm2672_vm0 = vmpackc.low %vm2670_vm1, %vm2671_vm9 }
 0x2b6   : > { %v1326_v16 = vsel %vm2672_vm0, %v924_v59, 0  ;;  %vm2674_vm3 = vmmov %vm2673_vm13  ;;  %vm2685_vm0 = vcmask 916480  }
 0x2b7   : > { %1509 = vmatmul.msk.bf16.vlgmr.msrb.gmra.mxu1 %vm2674_vm3, %v934_v17  ;;  %vm2676_vm7 = vmmov %vm2675_vm6 }
 0x2b8   : > { %vm2677_vm4 = vmmov %vm2674_vm3 }
 0x2b9   : > { %vm2678_vm8 = vmmov %vm2674_vm3 }
 0x2ba   : > { %vm2680_vm14 = vmmov %vm2679_vm15 }
 0x2bb   : > { %1184 = vrot.lane.b32.xlu2 %v1174_v37, %s1669_s26  ;;  %1127 = vrot.lane.b32.xlu0 %v927_v62, %s1668_s25  ;;  %vm2682_vm2 = vmmov %vm2681_vm12 }
 0x2bc   : > { %1129 = vrot.lane.b32.xlu1 %v924_v59, %s1668_s25  ;;  %vm2683_vm1 = vmmov %vm2674_vm3  ;;  %s215_s25 = sand.u32 1, %s1648_s19  }
 0x2bd   : > { %vm2684_vm9 = vmmov %vm2683_vm1 }
 0x2be   : > { %vm2686_vm13 = vmmov %vm2685_vm0 }
 0x2bf   : > { %vm2687_vm3 = vmmov %vm2683_vm1 }
 0x2c3   : > { %1337 = vrot.lane.b32.xlu2 %v1327_v45, %s1672_s11  ;;  %1080 = vrot.lane.b32.xlu0 %v1072_v46, %s1667_s23 }
 0x2c4   : > { %1082 = vrot.lane.b32.xlu1 %v1073_v57, %s1667_s23  ;;  %v1522_v57 = vld [vmem:[%s2480_s3 + $0xc] sm:$0x3] }
 0x2cb   : > { %1284 = vrot.lane.b32.xlu2 %v930_v52, %s1671_s6  ;;  %1233 = vrot.lane.b32.xlu0 %v1225_v58, %s1670_s30 }
 0x2cc   : > { %1235 = vrot.lane.b32.xlu1 %v1226_v5, %s1670_s30  ;;  %s1537_s30 = sshll.u32 %s1724_s22, 3  ;;  %s1397_s22 = scalar_lea.sflag [#allocation3], %s215_s25 }
 0x2cd   : > { %s1408_s16 = scalar_lea.hbm %s2482_s5, %s1537_s30 }
 0x2ce   : > { %s1412_s9 = sshll.u32 %s1408_s16, 4  ;;  %s1413_s9 = int_to_ptr.hbm [resolvable:$true] %s1412_s9 }
 0x2cf   : > { %s1608_s10 = sshra.s32 %s1413_s9, 4  ;;  %s1609_s10 = int_to_ptr.hbm [resolvable:$true] %s1608_s10 }
 0x2d0   : > { %s1610_s13 = scalar_lea.hbm %s1609_s10, 8  ;;  %p1615_p0 = scmp.lt.s32.totalorder %s1609_s10, %s2482_s5 }
 0x2d1   : > { %p1611_p11 = scmp.ne.s32.totalorder %s1609_s10, %s1610_s13  ;;  %p1616_p1 = scmp.lt.s32.totalorder %s1614_s15, %s1610_s13 }
 0x2d3   : > { %1180 = vrot.lane.b32.xlu0 %v1172_v7, %s1669_s26  ;;  %p1612_p12 = pnand %p1611_p11, %p1741_p5  ;;  %p1617_p2 = por %p1616_p1, %p1615_p0 }
 0x2d4   : > { %1182 = vrot.lane.b32.xlu1 %v1173_v9, %s1669_s26  ;;  %s1476_s26 = sshll.u32 %s215_s25, 3 }
 0x2d5   : > { %s217_s7 = scalar_lea.vmem [#allocation2], %s1476_s26  ;;  %p1613_p13 = pneg %p1612_p12 }
 0x2d6   : > { %s1410_s8 = sshll.u32 %s217_s7, 4  ;;  %s1411_s8 = int_to_ptr.vmem [resolvable:$true] %s1410_s8 }
 0x2d7   : > { %p1618_p3 = pnand %p1617_p2, %p1613_p13 }
 0x2db   : > { %1333 = vrot.lane.b32.xlu0 %v1325_v10, %s1672_s11 }
 0x2dc   : > { %1335 = vrot.lane.b32.xlu1 %v1326_v16, %s1672_s11 }
 0x2e3   : > { %1280 = vrot.lane.b32.xlu0 %v927_v62, %s1671_s6 }
 0x2e4   : > { %1282 = vrot.lane.b32.xlu1 %v924_v59, %s1671_s6 }
 0x2ec   : > { %1381 = vperm.xlu1 %1593, %v1378_v53  }
 0x2ed   : > { %v944_v28 = vpop.permute.xlu2 %943 }
 0x2f5   : > { %v1032_v29 = vpop.permute.xlu2 %1031 }
 0x2fd   : > { %v1132_v19 = vpop.permute.xlu2 %1131 }
 0x305   : > { %v1085_v2 = vpop.permute.xlu2 %1084 }
 0x30d   : > { %v1238_v33 = vpop.permute.xlu2 %1237 }
 0x315   : > { %v1185_v52 = vpop.permute.xlu2 %1184 }
 0x31d   : > { %v940_v31 = vpop.permute.xlu0 %939  ;;  %v1338_v0 = vpop.permute.xlu2 %1337 }
 0x31e   : > { %v942_v32 = vpop.permute.xlu1 %941 }
 0x31f   : > { %v945_v40 = vsel %vm2675_vm6, %v940_v31, %v942_v32  ;;  %v946_v43 = vsel %vm2676_vm7, %v942_v32, %v944_v28  ;;  %vm2688_vm6 = vmmov %vm2683_vm1  ;;  %v1525_v28 = vld [vmem:[%s2480_s3 + $0xe] sm:$0x3] }
 0x320   : > { %v953_v13 = vsel %vm951_vm5, %v945_v40, 0  ;;  %v956_v15 = vsel %vm951_vm5, %v946_v43, 0  ;;  %vm2689_vm7 = vmmov %vm2683_vm1 }
 0x321   : > { %965 = vmatpush.bf16.msra.mxu2 %v953_v13  ;;  %978 = vmatpush.bf16.msra.mxu3 %v956_v15 }
 0x324   : > { %1506 = vmatmul.msk.bf16.vlgmr.msra.gmra.mxu2 %vm2677_vm4, %v1505_v18  ;;  %1507 = vmatmul.msk.bf16.vlgmr.msra.gmra.mxu3 %vm2678_vm8, %v1505_v18  ;;  %vm2690_vm4 = vmmov %vm2683_vm1 }
 0x325   : > { %v1028_v22 = vpop.permute.xlu0 %1027  ;;  %vm2692_vm8 = vmmov %vm2683_vm1  ;;  %v1285_v5 = vpop.permute.xlu2 %1284 }
 0x326   : > { %v1030_v23 = vpop.permute.xlu1 %1029 }
 0x327   : > { %v1033_v63 = vsel %vm2679_vm15, %v1028_v22, %v1030_v23  ;;  %v1034_v48 = vsel %vm2680_vm14, %v1030_v23, %v1032_v29  ;;  %vm2693_vm15 = vcmask 769024   ;;  %vm2695_vm14 = vmmov %vm2683_vm1  ;;  %v1528_v29 = vld [vmem:[%s2480_s3 + $0x10] sm:$0x3] }
 0x328   : > { %v1039_v3 = vsel %vm951_vm5, %v1033_v63, 0  ;;  %v1042_v4 = vsel %vm951_vm5, %v1034_v48, 0 }
 0x329   : > { %1051 = vmatpush.bf16.msrb.mxu2 %v1039_v3  ;;  %1064 = vmatpush.bf16.msrb.mxu3 %v1042_v4 }
 0x32d   : > { %v1128_v1 = vpop.permute.xlu0 %1127 }
 0x32e   : > { %v1130_v8 = vpop.permute.xlu1 %1129 }
 0x32f   : > { %v1133_v11 = vsel %vm2681_vm12, %v1128_v1, %v1130_v8  ;;  %v1134_v20 = vsel %vm2682_vm2, %v1130_v8, %v1132_v19  ;;  %vm2696_vm12 = vmmov %vm2683_vm1  ;;  %vm2697_vm2 = vcmask 777216  }
 0x330   : > { %v1139_v21 = vsel %vm951_vm5, %v1133_v11, 0  ;;  %v1142_v12 = vsel %vm951_vm5, %v1134_v20, 0 }
 0x331   : > { %1151 = vmatpush.bf16.msra.mxu2 %v1139_v21  ;;  %1164 = vmatpush.bf16.msra.mxu3 %v1142_v12  ;;  %v1002_v31 = vpop.f32.mrf.mxu0 }
 0x334   : > { %1511 = vmatmul.msk.bf16.vlgmr.msrb.gmra.mxu2 %vm2683_vm1, %v1510_v14  ;;  %1512 = vmatmul.msk.bf16.vlgmr.msrb.gmra.mxu3 %vm2684_vm9, %v1510_v14  ;;  %vm2699_vm9 = vmmov %vm2687_vm3  ;;  %v1015_v32 = vpop.f32.mrf.mxu1 }
 0x335   : > { %v1081_v24 = vpop.permute.xlu0 %1080 }
 0x336   : > { %v1083_v27 = vpop.permute.xlu1 %1082 }
 0x337   : > { %v1086_v42 = vsel %vm2685_vm0, %v1081_v24, %v1083_v27  ;;  %v1087_v30 = vsel %vm2686_vm13, %v1083_v27, %v1085_v2  ;;  %vm2700_vm0 = vmmov %vm2687_vm3 }
 0x338   : > { %v1092_v34 = vsel %vm951_vm5, %v1086_v42, 0  ;;  %v1095_v41 = vsel %vm951_vm5, %v1087_v30, 0  ;;  %vm2701_vm13 = vmmov %vm2700_vm0 }
 0x339   : > { %1104 = vmatpush.bf16.msra.mxu0 %v1092_v34  ;;  %1117 = vmatpush.bf16.msra.mxu1 %v1095_v41  ;;  %v1004_v40 = vpop.f32.mrf.mxu0 }
 0x33c   : > { %1514 = vmatmul.msk.bf16.vlgmr.msra.gmra.mxu0 %vm2687_vm3, %v1513_v38  ;;  %1515 = vmatmul.msk.bf16.vlgmr.msra.gmra.mxu1 %vm2688_vm6, %v1513_v38  ;;  %vm2702_vm3 = vmmov %vm2700_vm0  ;;  %v1017_v43 = vpop.f32.mrf.mxu1 }
 0x33d   : > { %v1234_v35 = vpop.permute.xlu0 %1233 }
 0x33e   : > { %v1236_v44 = vpop.permute.xlu1 %1235 }
 0x33f   : > { %v1239_v47 = vsel %vm735_vm11, %v1234_v35, %v1236_v44  ;;  %v1240_v49 = vsel %vm735_vm11, %v1236_v44, %v1238_v33  ;;  %vm2691_vm11 = vmmov %vm2683_vm1 }
 0x340   : > { %v1245_v50 = vsel %vm951_vm5, %v1239_v47, 0  ;;  %v1248_v51 = vsel %vm951_vm5, %v1240_v49, 0  ;;  %vm2698_vm1 = vmmov %vm2697_vm2 }
 0x341   : > { %1257 = vmatpush.bf16.msrb.mxu2 %v1245_v50  ;;  %1270 = vmatpush.bf16.msrb.mxu3 %v1248_v51 }
 0x344   : > { %1517 = vmatmul.msk.bf16.vlgmr.msra.gmra.mxu2 %vm2689_vm7, %v1516_v39  ;;  %1518 = vmatmul.msk.bf16.vlgmr.msra.gmra.mxu3 %vm2690_vm4, %v1516_v39 }
 0x345   : > { %v1181_v54 = vpop.permute.xlu0 %1180 }
 0x346   : > { %v1183_v59 = vpop.permute.xlu1 %1182 }
 0x347   : > { %v1186_v62 = vsel %vm654_vm10, %v1181_v54, %v1183_v59  ;;  %v1187_v61 = vsel %vm654_vm10, %v1183_v59, %v1185_v52  ;;  %vm2694_vm10 = vmmov %vm2693_vm15 }
 0x348   : > { %v1192_v60 = vsel %vm951_vm5, %v1186_v62, 0  ;;  %v1195_v56 = vsel %vm951_vm5, %v1187_v61, 0 }
 0x349   : > { %1204 = vmatpush.bf16.msrb.mxu0 %v1192_v60  ;;  %1217 = vmatpush.bf16.msrb.mxu1 %v1195_v56 }
 0x34c   : > { %1520 = vmatmul.msk.bf16.vlgmr.msrb.gmra.mxu0 %vm2691_vm11, %v1519_v55  ;;  %1521 = vmatmul.msk.bf16.vlgmr.msrb.gmra.mxu1 %vm2692_vm8, %v1519_v55 }
 0x34d   : > { %v1334_v25 = vpop.permute.xlu0 %1333 }
 0x34e   : > { %v1336_v26 = vpop.permute.xlu1 %1335 }
 0x34f   : > { %v1339_v36 = vsel %vm2693_vm15, %v1334_v25, %v1336_v26  ;;  %v1340_v37 = vsel %vm2694_vm10, %v1336_v26, %v1338_v0 }
 0x350   : > { %v1345_v45 = vsel %vm951_vm5, %v1339_v36, 0  ;;  %v1348_v46 = vsel %vm951_vm5, %v1340_v37, 0 }
 0x351   : > { %1357 = vmatpush.bf16.msra.mxu2 %v1345_v45  ;;  %1370 = vmatpush.bf16.msra.mxu3 %v1348_v46 }
 0x354   : > { %1523 = vmatmul.msk.bf16.vlgmr.msrb.gmra.mxu2 %vm2695_vm14, %v1522_v57  ;;  %1524 = vmatmul.msk.bf16.vlgmr.msrb.gmra.mxu3 %vm2696_vm12, %v1522_v57 }
 0x355   : > { %v1281_v58 = vpop.permute.xlu0 %1280 }
 0x356   : > { %v1283_v7 = vpop.permute.xlu1 %1282 }
 0x357   : > { %v1286_v9 = vsel %vm2697_vm2, %v1281_v58, %v1283_v7  ;;  %v1287_v10 = vsel %vm2698_vm1, %v1283_v7, %v1285_v5 }
 0x358   : > { %v1292_v16 = vsel %vm951_vm5, %v1286_v9, 0  ;;  %v1295_v17 = vsel %vm951_vm5, %v1287_v10, 0  ;;  %vm1391_vm5 = vcmask 1043456  }
 0x359   : > { %1304 = vmatpush.bf16.msra.mxu0 %v1292_v16  ;;  %1317 = vmatpush.bf16.msra.mxu1 %v1295_v17 }
 0x35c   : > { %1526 = vmatmul.msk.bf16.vlgmr.msra.gmra.mxu0 %vm2699_vm9, %v1525_v28  ;;  %1527 = vmatmul.msk.bf16.vlgmr.msra.gmra.mxu1 %vm2700_vm0, %v1525_v28 }
 0x35e   : > { %v1382_v0 = vpop.permute.xlu1 %1381 }
 0x364   : > { %1529 = vmatmul.msk.bf16.vlgmr.msra.gmra.mxu2 %vm2701_vm13, %v1528_v29  ;;  %1530 = vmatmul.msk.bf16.vlgmr.msra.gmra.mxu3 %vm2702_vm3, %v1528_v29 }
 0x3a7   : > { %v967_v13 = vpop.f32.mrf.mxu2  ;;  %v980_v15 = vpop.f32.mrf.mxu3 }
 0x3a8   : > { %v1003_v42 = vadd.f32 %v1002_v31, %v967_v13  ;;  %v1016_v30 = vadd.f32 %v1015_v32, %v980_v15 }
 0x3af   : > { %v969_v18 = vpop.f32.mrf.mxu2  ;;  %v982_v19 = vpop.f32.mrf.mxu3 }
 0x3b7   : > { %v1053_v22 = vpop.f32.mrf.mxu2  ;;  %v1066_v23 = vpop.f32.mrf.mxu3 }
 0x3b8   : > { %v1070_v33 = vadd.f32 %v1053_v22, %v1003_v42  ;;  %v1071_v34 = vadd.f32 %v1066_v23, %v1016_v30 }
 0x3b9   : > { %v1106_v63 = vpop.f32.mrf.mxu0  ;;  %v1119_v48 = vpop.f32.mrf.mxu1 }
 0x3ba   : > { %v1123_v47 = vadd.f32 %v1106_v63, %v1070_v33  ;;  %v1124_v49 = vadd.f32 %v1119_v48, %v1071_v34 }
 0x3bf   : > { %v1055_v3 = vpop.f32.mrf.mxu2  ;;  %v1068_v4 = vpop.f32.mrf.mxu3 }
 0x3c1   : > { %v1108_v1 = vpop.f32.mrf.mxu0  ;;  %v1121_v2 = vpop.f32.mrf.mxu1 }
 0x3c7   : > { %v1153_v8 = vpop.f32.mrf.mxu2  ;;  %v1166_v11 = vpop.f32.mrf.mxu3 }
 0x3c8   : > { %v1170_v50 = vadd.f32 %v1153_v8, %v1123_v47  ;;  %v1171_v51 = vadd.f32 %v1166_v11, %v1124_v49 }
 0x3c9   : > { %v1206_v20 = vpop.f32.mrf.mxu0  ;;  %v1219_v21 = vpop.f32.mrf.mxu1 }
 0x3ca   : > { %v1223_v53 = vadd.f32 %v1206_v20, %v1170_v50  ;;  %v1224_v54 = vadd.f32 %v1219_v21, %v1171_v51 }
 0x3cf   : > { %v1155_v12 = vpop.f32.mrf.mxu2  ;;  %v1168_v14 = vpop.f32.mrf.mxu3 }
 0x3d1   : > { %v1208_v24 = vpop.f32.mrf.mxu0  ;;  %v1221_v27 = vpop.f32.mrf.mxu1 }
 0x3d7   : > { %v1259_v41 = vpop.f32.mrf.mxu2  ;;  %v1272_v38 = vpop.f32.mrf.mxu3 }
 0x3d8   : > { %v1276_v61 = vadd.f32 %v1259_v41, %v1223_v53  ;;  %v1277_v60 = vadd.f32 %v1272_v38, %v1224_v54 }
 0x3d9   : > { %v1306_v35 = vpop.f32.mrf.mxu0  ;;  %v1319_v44 = vpop.f32.mrf.mxu1 }
 0x3da   : > { %v1323_v56 = vadd.f32 %v1306_v35, %v1276_v61  ;;  %v1324_v55 = vadd.f32 %v1319_v44, %v1277_v60 }
 0x3df   : > { %v1261_v39 = vpop.f32.mrf.mxu2  ;;  %v1274_v52 = vpop.f32.mrf.mxu3 }
 0x3e1   : > { %v1321_v59 = vpop.f32.mrf.mxu1  ;;  %v1308_v62 = vpop.f32.mrf.mxu0 }
 0x3e7   : > { %v1359_v25 = vpop.f32.mrf.mxu2  ;;  %v1372_v26 = vpop.f32.mrf.mxu3 }
 0x3e8   : > { %v1376_v36 = vadd.f32 %v1359_v25, %v1323_v56  ;;  %v1377_v37 = vadd.f32 %v1372_v26, %v1324_v55 }
 0x3ea   : > { %v1384_v45 = vadd.f32 %v1382_v0, %v1376_v36  ;;  %v1385_v46 = vadd.f32 %v1382_v0, %v1377_v37 }
 0x3ec   : > { %v1387_v57 = vmax.f32 %v1385_v46, 0.0  ;;  %v1386_v58 = vmax.f32 %v1384_v45, 0.0 }
 0x3ee   : > { %v1390_v5 = vrot.slane %v1387_v57, 4 }
 0x3ef   : > { %v1374_v7 = vpop.f32.mrf.mxu3  ;;  %v1361_v9 = vpop.f32.mrf.mxu2 }
 0x3f0   : > { %v1392_v10 = vsel %vm1391_vm5, %v1386_v58, %v1390_v5 }
 0x3f1   : > { %v1394_v16 = vadd.f32 %v1392_v10, %v1756_v6 }
 0x3f3   : > { %1395 = vst [vmem:[%s217_s7] sm:$0xff] %v1394_v16 }
 0x3f4   : > { %1621 = shalt.err (!%p1618_p3)
}
 0x3f5   : > { %1538 = dma.vmem_to_hbm [thread:$0]  (%p1741_p5), %s1411_s8, 128, %s1413_s9, %s1397_s22  }
 0x3f6 PF: > { %p1544_p4 = scmp.ge.s32.totalorder %s1656_s21, 2  ;;  %s1424_s25 = sand.u32 1, %s1644_s18  }
 0x3f7   : > { %s1425_s26 = scalar_lea.sflag [#allocation3], %s1424_s25 }
 0x3f8   : > { %p1541_p7 = pnand %p1544_p4, %p1745_p6 }
 0x3fa   : > { %p1542_p8 = pneg %p1541_p7 }
 0x3fc   : > { %1639 = dma.done.wait (%p1542_p8), %s1425_s26, 128  }
 0x3fd   : > { %1641 = vsyncadd (%p1542_p8), %s1425_s26, 4294967168  ;;  %p15_p9 = scmp.ge.s32.totalorder %s1728_s24, 4   ;;  %s2703_s18 = smov %s1648_s19 }
 0x3fe   : > { %s2704_s19 = smov %s1652_s20  ;;  %s2705_s20 = smov %s1739_s27 }
 0x3ff   : > { %s2706_s21 = smov %s1728_s24  ;;  %17 = sbr.rel (!%p15_p9) target bundleno = 3 (0x3), region = 91 }
 0x404   :  { %1431 = vsyncpa [#allocation3], 1 }
 0x405   :  { %1433 = vsyncpa [#allocation3 + $0x1], 1 }

</bundles_post_ra>
